<compile_context>
chip_gen: v7x
topology: tpu7x:2x2x1
jax: 0.10.0
libtpu: 0.0.40
codegen_flags: <defaults>
</compile_context>

<pallas_src>
import jax
import jax.numpy as jnp
from jax.experimental import pallas as pl
from jax.experimental.pallas import tpu as pltpu  # noqa: F401  (TPU backend assumed)

BN_EPS = 1e-5
LANE = 128  # TPU lane width: pad all feature dims to a multiple of this.


# ---------------------------------------------------------------------------
# Fused kernel
# ---------------------------------------------------------------------------
def _block(h_f32, w_ref, b_ref, gamma_ref, beta_ref):
    """Linear (bf16 MXU, f32 accumulation) -> BatchNorm1d(train) -> ReLU."""
    y = jnp.dot(h_f32.astype(jnp.bfloat16), w_ref[...],
                preferred_element_type=jnp.float32) + b_ref[...]     # (N, out)
    mean = jnp.mean(y, axis=0, keepdims=True)                        # (1, out)
    centered = y - mean
    var = jnp.mean(centered * centered, axis=0, keepdims=True)       # biased var
    scale = gamma_ref[...] * jax.lax.rsqrt(var + BN_EPS)             # (1, out)
    shift = beta_ref[...] - mean * scale                             # (1, out)
    return jnp.maximum(y * scale + shift, 0.0)                       # ReLU, f32


def _generator_kernel(x_ref,
                      w0, b0, g0, t0,
                      w1, b1, g1, t1,
                      w2, b2, g2, t2,
                      w3, b3, g3, t3,
                      w4, b4,
                      o_ref):
    h = x_ref[...]                                   # (N, z_pad) f32
    h = _block(h, w0, b0, g0, t0)
    h = _block(h, w1, b1, g1, t1)
    h = _block(h, w2, b2, g2, t2)
    h = _block(h, w3, b3, g3, t3)
    y = jnp.dot(h.astype(jnp.bfloat16), w4[...],
                preferred_element_type=jnp.float32) + b4[...]
    o_ref[...] = jax.nn.sigmoid(y).astype(o_ref.dtype)


# ---------------------------------------------------------------------------
# Wrapper: pad feature dims to 128, keep everything in VMEM, single launch.
# ---------------------------------------------------------------------------
def _pad_dim(x, axis, multiple):
    pad = (-x.shape[axis]) % multiple
    if pad == 0:
        return x
    widths = [(0, 0)] * x.ndim
    widths[axis] = (0, pad)
    return jnp.pad(x, widths)


def _full_spec(shape):
    # Full-array block (always legal); grid is (), so index_map takes no args.
    return pl.BlockSpec(shape, lambda: (0,) * len(shape))


@jax.jit
def generator_forward(noise, params):
    """Fused generator forward.  noise: (N, z_dim) f32, params: list of dicts."""
    n = noise.shape[0]
    im_dim = params[-1]["w"].shape[1]

    # Pad feature dims to multiples of 128.  The batch axis is NOT padded:
    # BatchNorm statistics must be computed over exactly the real batch.
    x = _pad_dim(noise.astype(jnp.float32), 1, LANE)

    flat = [x]
    flops = 0
    transcendentals = 0
    bytes_accessed = x.size * 4
    out_pad = None
    for layer in params:
        w = _pad_dim(_pad_dim(layer["w"].astype(jnp.bfloat16), 0, LANE), 1, LANE)
        b = _pad_dim(layer["b"].astype(jnp.float32), 1, LANE)
        flat += [w, b]
        flops += 2 * n * w.shape[0] * w.shape[1]
        bytes_accessed += w.size * 2 + b.size * 4
        if "gamma" in layer:
            g = _pad_dim(layer["gamma"].astype(jnp.float32), 1, LANE)
            t = _pad_dim(layer["beta"].astype(jnp.float32), 1, LANE)
            flat += [g, t]
            bytes_accessed += (g.size + t.size) * 4
            transcendentals += w.shape[1]          # rsqrt per feature
        else:
            transcendentals += n * w.shape[1]      # sigmoid per output element
        out_pad = w.shape[1]
    bytes_accessed += n * out_pad * 4

    out = pl.pallas_call(
        _generator_kernel,
        out_shape=jax.ShapeDtypeStruct((n, out_pad), jnp.float32),
        in_specs=[_full_spec(a.shape) for a in flat],
        out_specs=_full_spec((n, out_pad)),
        cost_estimate=pl.CostEstimate(
            flops=flops,
            transcendentals=transcendentals,
            bytes_accessed=bytes_accessed),
    )(*flat)
    return out[:, :im_dim]


# ---------------------------------------------------------------------------
# Parameters + pure-JAX reference (mirrors the kernel's bf16 matmul operands)
# ---------------------------------------------------------------------------
def init_generator_params(key, z_dim, im_dim, hidden_dim):
    """Deterministic synthetic parameters with the module's shapes."""
    dims = [z_dim, hidden_dim, hidden_dim * 2, hidden_dim * 4, hidden_dim * 8, im_dim]
    params = []
    for i in range(len(dims) - 1):
        in_d, out_d = dims[i], dims[i + 1]
        key, kw, kb = jax.random.split(key, 3)
        bound = 1.0 / jnp.sqrt(jnp.float32(in_d))
        # Stored as (in_dim, out_dim): already transposed for x @ W.
        w = jax.random.uniform(kw, (in_d, out_d), jnp.float32, -bound, bound)
        b = jax.random.uniform(kb, (1, out_d), jnp.float32, -bound, bound)
        layer = {"w": w, "b": b}
        if i < len(dims) - 2:  # hidden blocks carry BatchNorm affine params
            layer["gamma"] = jnp.ones((1, out_d), jnp.float32)
            layer["beta"] = jnp.zeros((1, out_d), jnp.float32)
        params.append(layer)
    return params


def generator_forward_ref(noise, params):
    x = noise.astype(jnp.float32)
    for layer in params[:-1]:
        y = jnp.dot(x.astype(jnp.bfloat16), layer["w"].astype(jnp.bfloat16),
                    preferred_element_type=jnp.float32) + layer["b"]
        mean = jnp.mean(y, axis=0, keepdims=True)
        var = jnp.mean((y - mean) ** 2, axis=0, keepdims=True)
        y = (y - mean) * jax.lax.rsqrt(var + BN_EPS)
        x = jnp.maximum(y * layer["gamma"] + layer["beta"], 0.0)
    head = params[-1]
    y = jnp.dot(x.astype(jnp.bfloat16), head["w"].astype(jnp.bfloat16),
                preferred_element_type=jnp.float32) + head["b"]
    return jax.nn.sigmoid(y)


if __name__ == "__main__":
    # Small shapes consistent with the module's forward: noise is (n_samples, z_dim).
    # batch=128 keeps the MXU M dimension fed (multiple of 8 sublanes as well).
    batch = 128
    z_dim = 8
    im_dim = 64
    hidden_dim = 32

    key = jax.random.PRNGKey(0)
    key_params, key_noise = jax.random.split(key)

    params = init_generator_params(key_params, z_dim, im_dim, hidden_dim)
    noise = jax.random.normal(key_noise, (batch, z_dim), jnp.float32)

    out = jax.block_until_ready(generator_forward(noise, params))
    assert out.shape == (batch, im_dim), out.shape

    ref = generator_forward_ref(noise, params)
    max_err = float(jnp.max(jnp.abs(out - ref)))
    assert max_err < 5e-3, f"mismatch vs reference: max |diff| = {max_err}"

    print("KERNEL_OK")
</pallas_src>

<mosaic_0001>
module attributes {stable_mosaic.version = 11 : i64} {
  func.func @_generator_kernel(%arg0: memref<128x128xf32, #tpu.memory_space<vmem>>, %arg1: memref<128x128xbf16, #tpu.memory_space<vmem>>, %arg2: memref<1x128xf32, #tpu.memory_space<vmem>>, %arg3: memref<1x128xf32, #tpu.memory_space<vmem>>, %arg4: memref<1x128xf32, #tpu.memory_space<vmem>>, %arg5: memref<128x128xbf16, #tpu.memory_space<vmem>>, %arg6: memref<1x128xf32, #tpu.memory_space<vmem>>, %arg7: memref<1x128xf32, #tpu.memory_space<vmem>>, %arg8: memref<1x128xf32, #tpu.memory_space<vmem>>, %arg9: memref<128x128xbf16, #tpu.memory_space<vmem>>, %arg10: memref<1x128xf32, #tpu.memory_space<vmem>>, %arg11: memref<1x128xf32, #tpu.memory_space<vmem>>, %arg12: memref<1x128xf32, #tpu.memory_space<vmem>>, %arg13: memref<128x256xbf16, #tpu.memory_space<vmem>>, %arg14: memref<1x256xf32, #tpu.memory_space<vmem>>, %arg15: memref<1x256xf32, #tpu.memory_space<vmem>>, %arg16: memref<1x256xf32, #tpu.memory_space<vmem>>, %arg17: memref<256x128xbf16, #tpu.memory_space<vmem>>, %arg18: memref<1x128xf32, #tpu.memory_space<vmem>>, %arg19: memref<128x128xf32, #tpu.memory_space<vmem>>) attributes {dimension_semantics = [], scalar_prefetch = 0 : i64, scratch_operands = 0 : i64, tpu.core_type = #tpu.core_type<tc>} {
    %c0 = arith.constant 0 : index
    %c0_0 = arith.constant 0 : index
    %0 = vector.load %arg0[%c0, %c0_0] : memref<128x128xf32, #tpu.memory_space<vmem>>, vector<128x128xf32>
    %1 = arith.truncf %0 : vector<128x128xf32> to vector<128x128xbf16>
    %c0_1 = arith.constant 0 : index
    %c0_2 = arith.constant 0 : index
    %2 = vector.load %arg1[%c0_1, %c0_2] : memref<128x128xbf16, #tpu.memory_space<vmem>>, vector<128x128xbf16>
    %cst = arith.constant dense<0.000000e+00> : vector<128x128xf32>
    %3 = tpu.matmul %1, %2, %cst {dimension_numbers = #tpu.dot_dimension_numbers<[1], [0], [0], [1], [0, 0, 1, 1], [], []>} : vector<128x128xbf16>, vector<128x128xbf16>, vector<128x128xf32> -> vector<128x128xf32>
    %c0_3 = arith.constant 0 : index
    %c0_4 = arith.constant 0 : index
    %4 = vector.load %arg2[%c0_3, %c0_4] : memref<1x128xf32, #tpu.memory_space<vmem>>, vector<1x128xf32>
    %5 = vector.broadcast %4 : vector<1x128xf32> to vector<128x128xf32>
    %6 = arith.addf %3, %5 : vector<128x128xf32>
    %cst_5 = arith.constant dense<0.000000e+00> : vector<128xf32>
    %7 = vector.multi_reduction <add>, %6, %cst_5 [0] : vector<128x128xf32> to vector<128xf32>
    %8 = vector.shape_cast %7 : vector<128xf32> to vector<1x128xf32>
    %cst_6 = arith.constant 1.280000e+02 : f32
    %9 = vector.broadcast %cst_6 : f32 to vector<1x128xf32>
    %10 = arith.divf %8, %9 : vector<1x128xf32>
    %11 = vector.broadcast %10 : vector<1x128xf32> to vector<128x128xf32>
    %12 = arith.subf %6, %11 : vector<128x128xf32>
    %13 = arith.mulf %12, %12 : vector<128x128xf32>
    %cst_7 = arith.constant dense<0.000000e+00> : vector<128xf32>
    %14 = vector.multi_reduction <add>, %13, %cst_7 [0] : vector<128x128xf32> to vector<128xf32>
    %15 = vector.shape_cast %14 : vector<128xf32> to vector<1x128xf32>
    %cst_8 = arith.constant 1.280000e+02 : f32
    %16 = vector.broadcast %cst_8 : f32 to vector<1x128xf32>
    %17 = arith.divf %15, %16 : vector<1x128xf32>
    %c0_9 = arith.constant 0 : index
    %c0_10 = arith.constant 0 : index
    %18 = vector.load %arg3[%c0_9, %c0_10] : memref<1x128xf32, #tpu.memory_space<vmem>>, vector<1x128xf32>
    %cst_11 = arith.constant 9.99999974E-6 : f32
    %19 = vector.broadcast %cst_11 : f32 to vector<1x128xf32>
    %20 = arith.addf %17, %19 : vector<1x128xf32>
    %21 = math.rsqrt %20 : vector<1x128xf32>
    %22 = arith.mulf %18, %21 : vector<1x128xf32>
    %c0_12 = arith.constant 0 : index
    %c0_13 = arith.constant 0 : index
    %23 = vector.load %arg4[%c0_12, %c0_13] : memref<1x128xf32, #tpu.memory_space<vmem>>, vector<1x128xf32>
    %24 = arith.mulf %10, %22 : vector<1x128xf32>
    %25 = arith.subf %23, %24 : vector<1x128xf32>
    %26 = vector.broadcast %22 : vector<1x128xf32> to vector<128x128xf32>
    %27 = arith.mulf %6, %26 : vector<128x128xf32>
    %28 = vector.broadcast %25 : vector<1x128xf32> to vector<128x128xf32>
    %29 = arith.addf %27, %28 : vector<128x128xf32>
    %cst_14 = arith.constant 0.000000e+00 : f32
    %30 = vector.broadcast %cst_14 : f32 to vector<128x128xf32>
    %31 = arith.maximumf %29, %30 : vector<128x128xf32>
    %32 = arith.truncf %31 : vector<128x128xf32> to vector<128x128xbf16>
    %c0_15 = arith.constant 0 : index
    %c0_16 = arith.constant 0 : index
    %33 = vector.load %arg5[%c0_15, %c0_16] : memref<128x128xbf16, #tpu.memory_space<vmem>>, vector<128x128xbf16>
    %cst_17 = arith.constant dense<0.000000e+00> : vector<128x128xf32>
    %34 = tpu.matmul %32, %33, %cst_17 {dimension_numbers = #tpu.dot_dimension_numbers<[1], [0], [0], [1], [0, 0, 1, 1], [], []>} : vector<128x128xbf16>, vector<128x128xbf16>, vector<128x128xf32> -> vector<128x128xf32>
    %c0_18 = arith.constant 0 : index
    %c0_19 = arith.constant 0 : index
    %35 = vector.load %arg6[%c0_18, %c0_19] : memref<1x128xf32, #tpu.memory_space<vmem>>, vector<1x128xf32>
    %36 = vector.broadcast %35 : vector<1x128xf32> to vector<128x128xf32>
    %37 = arith.addf %34, %36 : vector<128x128xf32>
    %cst_20 = arith.constant dense<0.000000e+00> : vector<128xf32>
    %38 = vector.multi_reduction <add>, %37, %cst_20 [0] : vector<128x128xf32> to vector<128xf32>
    %39 = vector.shape_cast %38 : vector<128xf32> to vector<1x128xf32>
    %cst_21 = arith.constant 1.280000e+02 : f32
    %40 = vector.broadcast %cst_21 : f32 to vector<1x128xf32>
    %41 = arith.divf %39, %40 : vector<1x128xf32>
    %42 = vector.broadcast %41 : vector<1x128xf32> to vector<128x128xf32>
    %43 = arith.subf %37, %42 : vector<128x128xf32>
    %44 = arith.mulf %43, %43 : vector<128x128xf32>
    %cst_22 = arith.constant dense<0.000000e+00> : vector<128xf32>
    %45 = vector.multi_reduction <add>, %44, %cst_22 [0] : vector<128x128xf32> to vector<128xf32>
    %46 = vector.shape_cast %45 : vector<128xf32> to vector<1x128xf32>
    %cst_23 = arith.constant 1.280000e+02 : f32
    %47 = vector.broadcast %cst_23 : f32 to vector<1x128xf32>
    %48 = arith.divf %46, %47 : vector<1x128xf32>
    %c0_24 = arith.constant 0 : index
    %c0_25 = arith.constant 0 : index
    %49 = vector.load %arg7[%c0_24, %c0_25] : memref<1x128xf32, #tpu.memory_space<vmem>>, vector<1x128xf32>
    %cst_26 = arith.constant 9.99999974E-6 : f32
    %50 = vector.broadcast %cst_26 : f32 to vector<1x128xf32>
    %51 = arith.addf %48, %50 : vector<1x128xf32>
    %52 = math.rsqrt %51 : vector<1x128xf32>
    %53 = arith.mulf %49, %52 : vector<1x128xf32>
    %c0_27 = arith.constant 0 : index
    %c0_28 = arith.constant 0 : index
    %54 = vector.load %arg8[%c0_27, %c0_28] : memref<1x128xf32, #tpu.memory_space<vmem>>, vector<1x128xf32>
    %55 = arith.mulf %41, %53 : vector<1x128xf32>
    %56 = arith.subf %54, %55 : vector<1x128xf32>
    %57 = vector.broadcast %53 : vector<1x128xf32> to vector<128x128xf32>
    %58 = arith.mulf %37, %57 : vector<128x128xf32>
    %59 = vector.broadcast %56 : vector<1x128xf32> to vector<128x128xf32>
    %60 = arith.addf %58, %59 : vector<128x128xf32>
    %cst_29 = arith.constant 0.000000e+00 : f32
    %61 = vector.broadcast %cst_29 : f32 to vector<128x128xf32>
    %62 = arith.maximumf %60, %61 : vector<128x128xf32>
    %63 = arith.truncf %62 : vector<128x128xf32> to vector<128x128xbf16>
    %c0_30 = arith.constant 0 : index
    %c0_31 = arith.constant 0 : index
    %64 = vector.load %arg9[%c0_30, %c0_31] : memref<128x128xbf16, #tpu.memory_space<vmem>>, vector<128x128xbf16>
    %cst_32 = arith.constant dense<0.000000e+00> : vector<128x128xf32>
    %65 = tpu.matmul %63, %64, %cst_32 {dimension_numbers = #tpu.dot_dimension_numbers<[1], [0], [0], [1], [0, 0, 1, 1], [], []>} : vector<128x128xbf16>, vector<128x128xbf16>, vector<128x128xf32> -> vector<128x128xf32>
    %c0_33 = arith.constant 0 : index
    %c0_34 = arith.constant 0 : index
    %66 = vector.load %arg10[%c0_33, %c0_34] : memref<1x128xf32, #tpu.memory_space<vmem>>, vector<1x128xf32>
    %67 = vector.broadcast %66 : vector<1x128xf32> to vector<128x128xf32>
    %68 = arith.addf %65, %67 : vector<128x128xf32>
    %cst_35 = arith.constant dense<0.000000e+00> : vector<128xf32>
    %69 = vector.multi_reduction <add>, %68, %cst_35 [0] : vector<128x128xf32> to vector<128xf32>
    %70 = vector.shape_cast %69 : vector<128xf32> to vector<1x128xf32>
    %cst_36 = arith.constant 1.280000e+02 : f32
    %71 = vector.broadcast %cst_36 : f32 to vector<1x128xf32>
    %72 = arith.divf %70, %71 : vector<1x128xf32>
    %73 = vector.broadcast %72 : vector<1x128xf32> to vector<128x128xf32>
    %74 = arith.subf %68, %73 : vector<128x128xf32>
    %75 = arith.mulf %74, %74 : vector<128x128xf32>
    %cst_37 = arith.constant dense<0.000000e+00> : vector<128xf32>
    %76 = vector.multi_reduction <add>, %75, %cst_37 [0] : vector<128x128xf32> to vector<128xf32>
    %77 = vector.shape_cast %76 : vector<128xf32> to vector<1x128xf32>
    %cst_38 = arith.constant 1.280000e+02 : f32
    %78 = vector.broadcast %cst_38 : f32 to vector<1x128xf32>
    %79 = arith.divf %77, %78 : vector<1x128xf32>
    %c0_39 = arith.constant 0 : index
    %c0_40 = arith.constant 0 : index
    %80 = vector.load %arg11[%c0_39, %c0_40] : memref<1x128xf32, #tpu.memory_space<vmem>>, vector<1x128xf32>
    %cst_41 = arith.constant 9.99999974E-6 : f32
    %81 = vector.broadcast %cst_41 : f32 to vector<1x128xf32>
    %82 = arith.addf %79, %81 : vector<1x128xf32>
    %83 = math.rsqrt %82 : vector<1x128xf32>
    %84 = arith.mulf %80, %83 : vector<1x128xf32>
    %c0_42 = arith.constant 0 : index
    %c0_43 = arith.constant 0 : index
    %85 = vector.load %arg12[%c0_42, %c0_43] : memref<1x128xf32, #tpu.memory_space<vmem>>, vector<1x128xf32>
    %86 = arith.mulf %72, %84 : vector<1x128xf32>
    %87 = arith.subf %85, %86 : vector<1x128xf32>
    %88 = vector.broadcast %84 : vector<1x128xf32> to vector<128x128xf32>
    %89 = arith.mulf %68, %88 : vector<128x128xf32>
    %90 = vector.broadcast %87 : vector<1x128xf32> to vector<128x128xf32>
    %91 = arith.addf %89, %90 : vector<128x128xf32>
    %cst_44 = arith.constant 0.000000e+00 : f32
    %92 = vector.broadcast %cst_44 : f32 to vector<128x128xf32>
    %93 = arith.maximumf %91, %92 : vector<128x128xf32>
    %94 = arith.truncf %93 : vector<128x128xf32> to vector<128x128xbf16>
    %c0_45 = arith.constant 0 : index
    %c0_46 = arith.constant 0 : index
    %95 = vector.load %arg13[%c0_45, %c0_46] : memref<128x256xbf16, #tpu.memory_space<vmem>>, vector<128x256xbf16>
    %cst_47 = arith.constant dense<0.000000e+00> : vector<128x256xf32>
    %96 = tpu.matmul %94, %95, %cst_47 {dimension_numbers = #tpu.dot_dimension_numbers<[1], [0], [0], [1], [0, 0, 1, 1], [], []>} : vector<128x128xbf16>, vector<128x256xbf16>, vector<128x256xf32> -> vector<128x256xf32>
    %c0_48 = arith.constant 0 : index
    %c0_49 = arith.constant 0 : index
    %97 = vector.load %arg14[%c0_48, %c0_49] : memref<1x256xf32, #tpu.memory_space<vmem>>, vector<1x256xf32>
    %98 = vector.broadcast %97 : vector<1x256xf32> to vector<128x256xf32>
    %99 = arith.addf %96, %98 : vector<128x256xf32>
    %cst_50 = arith.constant dense<0.000000e+00> : vector<256xf32>
    %100 = vector.multi_reduction <add>, %99, %cst_50 [0] : vector<128x256xf32> to vector<256xf32>
    %101 = vector.shape_cast %100 : vector<256xf32> to vector<1x256xf32>
    %cst_51 = arith.constant 1.280000e+02 : f32
    %102 = vector.broadcast %cst_51 : f32 to vector<1x256xf32>
    %103 = arith.divf %101, %102 : vector<1x256xf32>
    %104 = vector.broadcast %103 : vector<1x256xf32> to vector<128x256xf32>
    %105 = arith.subf %99, %104 : vector<128x256xf32>
    %106 = arith.mulf %105, %105 : vector<128x256xf32>
    %cst_52 = arith.constant dense<0.000000e+00> : vector<256xf32>
    %107 = vector.multi_reduction <add>, %106, %cst_52 [0] : vector<128x256xf32> to vector<256xf32>
    %108 = vector.shape_cast %107 : vector<256xf32> to vector<1x256xf32>
    %cst_53 = arith.constant 1.280000e+02 : f32
    %109 = vector.broadcast %cst_53 : f32 to vector<1x256xf32>
    %110 = arith.divf %108, %109 : vector<1x256xf32>
    %c0_54 = arith.constant 0 : index
    %c0_55 = arith.constant 0 : index
    %111 = vector.load %arg15[%c0_54, %c0_55] : memref<1x256xf32, #tpu.memory_space<vmem>>, vector<1x256xf32>
    %cst_56 = arith.constant 9.99999974E-6 : f32
    %112 = vector.broadcast %cst_56 : f32 to vector<1x256xf32>
    %113 = arith.addf %110, %112 : vector<1x256xf32>
    %114 = math.rsqrt %113 : vector<1x256xf32>
    %115 = arith.mulf %111, %114 : vector<1x256xf32>
    %c0_57 = arith.constant 0 : index
    %c0_58 = arith.constant 0 : index
    %116 = vector.load %arg16[%c0_57, %c0_58] : memref<1x256xf32, #tpu.memory_space<vmem>>, vector<1x256xf32>
    %117 = arith.mulf %103, %115 : vector<1x256xf32>
    %118 = arith.subf %116, %117 : vector<1x256xf32>
    %119 = vector.broadcast %115 : vector<1x256xf32> to vector<128x256xf32>
    %120 = arith.mulf %99, %119 : vector<128x256xf32>
    %121 = vector.broadcast %118 : vector<1x256xf32> to vector<128x256xf32>
    %122 = arith.addf %120, %121 : vector<128x256xf32>
    %cst_59 = arith.constant 0.000000e+00 : f32
    %123 = vector.broadcast %cst_59 : f32 to vector<128x256xf32>
    %124 = arith.maximumf %122, %123 : vector<128x256xf32>
    %125 = arith.truncf %124 : vector<128x256xf32> to vector<128x256xbf16>
    %c0_60 = arith.constant 0 : index
    %c0_61 = arith.constant 0 : index
    %126 = vector.load %arg17[%c0_60, %c0_61] : memref<256x128xbf16, #tpu.memory_space<vmem>>, vector<256x128xbf16>
    %cst_62 = arith.constant dense<0.000000e+00> : vector<128x128xf32>
    %127 = tpu.matmul %125, %126, %cst_62 {dimension_numbers = #tpu.dot_dimension_numbers<[1], [0], [0], [1], [0, 0, 1, 1], [], []>} : vector<128x256xbf16>, vector<256x128xbf16>, vector<128x128xf32> -> vector<128x128xf32>
    %c0_63 = arith.constant 0 : index
    %c0_64 = arith.constant 0 : index
    %128 = vector.load %arg18[%c0_63, %c0_64] : memref<1x128xf32, #tpu.memory_space<vmem>>, vector<1x128xf32>
    %129 = vector.broadcast %128 : vector<1x128xf32> to vector<128x128xf32>
    %130 = arith.addf %127, %129 : vector<128x128xf32>
    %131 = arith.negf %130 : vector<128x128xf32>
    %132 = math.exp %131 : vector<128x128xf32>
    %cst_65 = arith.constant 1.000000e+00 : f32
    %133 = vector.broadcast %cst_65 : f32 to vector<128x128xf32>
    %134 = arith.addf %133, %132 : vector<128x128xf32>
    %135 = arith.divf %133, %134 : vector<128x128xf32>
    %c0_66 = arith.constant 0 : index
    %c0_67 = arith.constant 0 : index
    %136 = vector.load %arg19[%c0_66, %c0_67] : memref<128x128xf32, #tpu.memory_space<vmem>>, vector<128x128xf32>
    tpu.vector_store %arg19[%c0_66, %c0_67], %135 {strides = array<i32>} : memref<128x128xf32, #tpu.memory_space<vmem>>, vector<128x128xf32>,
    return
  }
}

</mosaic_0001>

<bundles_post_ra>
// kernel: generator_forward.1
= control target key start
LH: loop header
LB: loop body
LE: loop exit
PB: predicated region body
PF: predicated region fallthrough
CT: control target
= control target key end

     0   :  { %s3479_s1 = inlined_call_operand.vmem [shape: bf16[128,128], index: 1, kind: input, shape index: {}]   ;;  %s3480_s0 = inlined_call_operand.vmem [shape: f32[128,128], index: 0, kind: input, shape index: {}]   ;;  %s3481_s5 = inlined_call_operand.vmem [shape: bf16[128,128], index: 5, kind: input, shape index: {}]   ;;  %s3482_s2 = inlined_call_operand.vmem [shape: f32[1,128], index: 2, kind: input, shape index: {}]   ;;  %s3483_s3 = inlined_call_operand.vmem [shape: f32[1,128], index: 3, kind: input, shape index: {}]   ;;  %s3484_s4 = inlined_call_operand.vmem [shape: f32[1,128], index: 4, kind: input, shape index: {}]   ;;  %s3485_s9 = inlined_call_operand.vmem [shape: bf16[128,128], index: 9, kind: input, shape index: {}]   ;;  %s3486_s6 = inlined_call_operand.vmem [shape: f32[1,128], index: 6, kind: input, shape index: {}]   ;;  %s3487_s7 = inlined_call_operand.vmem [shape: f32[1,128], index: 7, kind: input, shape index: {}]   ;;  %s3488_s8 = inlined_call_operand.vmem [shape: f32[1,128], index: 8, kind: input, shape index: {}]   ;;  %s3489_s13 = inlined_call_operand.vmem [shape: bf16[128,256], index: 13, kind: input, shape index: {}]   ;;  %s3490_s10 = inlined_call_operand.vmem [shape: f32[1,128], index: 10, kind: input, shape index: {}]   ;;  %s3491_s11 = inlined_call_operand.vmem [shape: f32[1,128], index: 11, kind: input, shape index: {}]   ;;  %s3492_s12 = inlined_call_operand.vmem [shape: f32[1,128], index: 12, kind: input, shape index: {}]   ;;  %s3493_s14 = inlined_call_operand.vmem [shape: f32[1,256], index: 14, kind: input, shape index: {}]   ;;  %s3494_s17 = inlined_call_operand.vmem [shape: bf16[256,128], index: 17, kind: input, shape index: {}]   ;;  %s3495_s15 = inlined_call_operand.vmem [shape: f32[1,256], index: 15, kind: input, shape index: {}]   ;;  %s3496_s16 = inlined_call_operand.vmem [shape: f32[1,256], index: 16, kind: input, shape index: {}]   ;;  %s3497_s18 = inlined_call_operand.vmem [shape: f32[1,128], index: 18, kind: input, shape index: {}]   ;;  %s3498_s19 = inlined_call_operand.vmem [shape: f32[128,128], index: 19, kind: output, shape index: {}]  }
   0x1   :  { %3502 = sst [smem:[#allocation2_spill]] %s3479_s1 }
   0x2   :  { %3503 = sst [smem:[#allocation3_spill]] %s3480_s0  ;;  %s3506_s20 = sld [smem:[#allocation2_spill]] }
   0x3   :  { %3504 = sst [smem:[#allocation4_spill]] %s3481_s5  ;;  %s3507_s26 = sld [smem:[#allocation3_spill]] }
   0x4   :  { %3505 = sst [smem:[#allocation5_spill]] %s3482_s2  ;;  %s3508_s2 = sld [smem:[#allocation4_spill]] }
   0x5   :  { %s3509_s29 = sld [smem:[#allocation5_spill]] }
   0x8   :  { %v2248_v0 = vld [vmem:[%s3506_s20] sm:$0xff]   ;;  %v2249_v1 = vld [vmem:[%s3506_s20 + $0x8] sm:$0xff]   ;;  %v2250_v2 = vld [vmem:[%s3506_s20 + $0x10] sm:$0xff]  }
   0x9   :  { %2134 = vmatprep.subr.bf16.mxu0 %v2248_v0  ;;  %v2251_v3 = vld [vmem:[%s3506_s20 + $0x18] sm:$0xff]   ;;  %v63_v4 = vld [vmem:[%s3507_s26] sm:$0xff]  ;;  %v64_v5 = vld [vmem:[%s3507_s26 + $0x8] sm:$0xff] }
   0xa   :  { %2135 = vmatpush3.bf16.msra.mxu0 %v2248_v0  ;;  %v79_v6 = vpack.c.bf16 %v64_v5, %v63_v4  ;;  %v2252_v7 = vld [vmem:[%s3506_s20 + $0x20] sm:$0xff]   ;;  %v2253_v8 = vld [vmem:[%s3506_s20 + $0x28] sm:$0xff]   ;;  %v2254_v9 = vld [vmem:[%s3506_s20 + $0x30] sm:$0xff]  }
   0xb   :  { %2136 = vmatprep.subr.bf16.mxu0 %v2249_v1  ;;  %v2255_v10 = vld [vmem:[%s3506_s20 + $0x38] sm:$0xff]   ;;  %v65_v11 = vld [vmem:[%s3507_s26 + $0x10] sm:$0xff]  ;;  %v67_v13 = vld [vmem:[%s3507_s26 + $0x20] sm:$0xff] }
   0xc   :  { %2150 = vmatprep.mubr.bf16.mxu0 %v79_v6  ;;  %v66_v12 = vld [vmem:[%s3507_s26 + $0x18] sm:$0xff]  ;;  %v68_v14 = vld [vmem:[%s3507_s26 + $0x28] sm:$0xff]  ;;  %v69_v17 = vld [vmem:[%s3507_s26 + $0x30] sm:$0xff] }
   0xd   :  { %v80_v15 = vpack.c.bf16 %v66_v12, %v65_v11  ;;  %v81_v16 = vpack.c.bf16 %v68_v14, %v67_v13  ;;  %v70_v18 = vld [vmem:[%s3507_s26 + $0x38] sm:$0xff]  ;;  %v71_v19 = vld [vmem:[%s3507_s26 + $0x40] sm:$0xff]  ;;  %v72_v20 = vld [vmem:[%s3507_s26 + $0x48] sm:$0xff] }
   0xe   :  { %2137 = vmatpush3.bf16.msra.mxu0 %v2249_v1  ;;  %v82_v21 = vpack.c.bf16 %v70_v18, %v69_v17  ;;  %v83_v22 = vpack.c.bf16 %v72_v20, %v71_v19  ;;  %v73_v23 = vld [vmem:[%s3507_s26 + $0x50] sm:$0xff]  ;;  %v74_v24 = vld [vmem:[%s3507_s26 + $0x58] sm:$0xff]  ;;  %v75_v25 = vld [vmem:[%s3507_s26 + $0x60] sm:$0xff] }
   0xf   :  { %2138 = vmatprep.subr.bf16.mxu0 %v2250_v2  ;;  %v76_v26 = vld [vmem:[%s3507_s26 + $0x68] sm:$0xff]  ;;  %v84_v27 = vpack.c.bf16 %v74_v24, %v73_v23  ;;  %v77_v29 = vld [vmem:[%s3507_s26 + $0x70] sm:$0xff]  ;;  %v78_v30 = vld [vmem:[%s3507_s26 + $0x78] sm:$0xff] }
  0x10   :  { %v85_v28 = vpack.c.bf16 %v76_v26, %v75_v25  ;;  %v86_v31 = vpack.c.bf16 %v78_v30, %v77_v29  ;;  %v2256_v32 = vld [vmem:[%s3508_s2] sm:$0xff]   ;;  %v2257_v33 = vld [vmem:[%s3508_s2 + $0x8] sm:$0xff]   ;;  %v2258_v34 = vld [vmem:[%s3508_s2 + $0x10] sm:$0xff]  }
  0x11   :  { %2166 = vmatprep.subr.bf16.mxu1 %v2256_v32  ;;  %v2259_v35 = vld [vmem:[%s3508_s2 + $0x18] sm:$0xff]   ;;  %v2260_v36 = vld [vmem:[%s3508_s2 + $0x20] sm:$0xff]   ;;  %v2261_v37 = vld [vmem:[%s3508_s2 + $0x28] sm:$0xff]  }
  0x12   :  { %2139 = vmatpush3.bf16.msra.mxu0 %v2250_v2  ;;  %2167 = vmatpush3.bf16.msra.mxu1 %v2256_v32  ;;  %v2262_v38 = vld [vmem:[%s3508_s2 + $0x30] sm:$0xff]   ;;  %v2263_v39 = vld [vmem:[%s3508_s2 + $0x38] sm:$0xff]   ;;  %v1946_v41 = vld [vmem:[%s3509_s29] ss:$0 sm:$0xff] }
  0x13   :  { %2140 = vmatprep.subr.bf16.mxu0 %v2251_v3  ;;  %2168 = vmatprep.subr.bf16.mxu1 %v2257_v33 }
  0x16   :  { %2141 = vmatpush3.bf16.msra.mxu0 %v2251_v3  ;;  %2169 = vmatpush3.bf16.msra.mxu1 %v2257_v33 }
  0x17   :  { %2142 = vmatprep.subr.bf16.mxu0 %v2252_v7  ;;  %2170 = vmatprep.subr.bf16.mxu1 %v2258_v34 }
  0x1a   :  { %2143 = vmatpush3.bf16.msra.mxu0 %v2252_v7  ;;  %2171 = vmatpush3.bf16.msra.mxu1 %v2258_v34 }
  0x1b   :  { %2144 = vmatprep.subr.bf16.mxu0 %v2253_v8  ;;  %2172 = vmatprep.subr.bf16.mxu1 %v2259_v35 }
  0x1e   :  { %2145 = vmatpush3.bf16.msra.mxu0 %v2253_v8  ;;  %2173 = vmatpush3.bf16.msra.mxu1 %v2259_v35 }
  0x1f   :  { %2146 = vmatprep.subr.bf16.mxu0 %v2254_v9  ;;  %2174 = vmatprep.subr.bf16.mxu1 %v2260_v36 }
  0x22   :  { %2147 = vmatpush3.bf16.msra.mxu0 %v2254_v9  ;;  %2175 = vmatpush3.bf16.msra.mxu1 %v2260_v36 }
  0x23   :  { %2148 = vmatprep.subr.bf16.mxu0 %v2255_v10  ;;  %2176 = vmatprep.subr.bf16.mxu1 %v2261_v37 }
  0x26   :  { %2149 = vmatpush3.bf16.msra.mxu0 %v2255_v10  ;;  %2177 = vmatpush3.bf16.msra.mxu1 %v2261_v37 }
  0x27   :  { %2178 = vmatprep.subr.bf16.mxu1 %v2262_v38 }
  0x29   :  { %2151 = vmatmul.mubr.bf16.vlgmr.msra.gmra.mrb[0].mxu0 %v80_v15 }
  0x2a   :  { %2154 = vmatprep.mubr.bf16.mxu0 %v81_v16  ;;  %2179 = vmatpush3.bf16.msra.mxu1 %v2262_v38 }
  0x2b   :  { %2180 = vmatprep.subr.bf16.mxu1 %v2263_v39 }
  0x2e   :  { %2181 = vmatpush3.bf16.msra.mxu1 %v2263_v39 }
  0x31   :  { %2155 = vmatmul.mubr.bf16.gmra.mrb[4].mxu0 %v82_v21 }
  0x32   :  { %2158 = vmatprep.mubr.bf16.mxu0 %v83_v22 }
  0x39   :  { %2159 = vmatmul.mubr.bf16.gmra.mrb[8].mxu0 %v84_v27 }
  0x3a   :  { %2162 = vmatprep.mubr.bf16.mxu0 %v85_v28 }
  0x41   :  { %2163 = vmatmul.mubr.bf16.gmra.mrb[12].mxu0 %v86_v31 }
  0xfc   :  { %v2152_v40 = vpop.f32.mrb[0].mxu0 }
  0xfd   :  { %v192_v42 = vpop.f32.mrb[1].mxu0  ;;  %v2591_v47 = vadd.f32 %v2152_v40, %v1946_v41 }
  0xfe   :  { %v2153_v43 = vpop.f32.mrb[2].mxu0  ;;  %v2587_v45 = vadd.f32 %v1946_v41, %v192_v42 }
  0xff   :  { %v195_v44 = vpop.f32.mrb[3].mxu0  ;;  %v2595_v49 = vadd.f32 %v2153_v43, %v1946_v41 }
 0x100   :  { %v2589_v46 = vadd.f32 %v1946_v41, %v195_v44 }
 0x102   :  { %v255_v48 = vadd.f32 %v2589_v46, %v2587_v45 }
 0x104   :  { %v256_v50 = vadd.f32 %v255_v48, %v2591_v47  ;;  %v2156_v51 = vpop.f32.mrb[4].mxu0 }
 0x105   :  { %v208_v52 = vpop.f32.mrb[5].mxu0  ;;  %v2604_v59 = vadd.f32 %v2156_v51, %v1946_v41 }
 0x106   :  { %v2598_v53 = vadd.f32 %v1946_v41, %v208_v52  ;;  %v257_v54 = vadd.f32 %v256_v50, %v2595_v49  ;;  %v2157_v55 = vpop.f32.mrb[6].mxu0 }
 0x107   :  { %v211_v56 = vpop.f32.mrb[7].mxu0  ;;  %v2607_v61 = vadd.f32 %v2157_v55, %v1946_v41 }
 0x108   :  { %v258_v57 = vadd.f32 %v257_v54, %v2598_v53  ;;  %v2602_v58 = vadd.f32 %v1946_v41, %v211_v56 }
 0x10a   :  { %v259_v60 = vadd.f32 %v258_v57, %v2602_v58 }
 0x10c   :  { %v260_v62 = vadd.f32 %v259_v60, %v2604_v59  ;;  %v2160_v63 = vpop.f32.mrb[8].mxu0 }
 0x10d   :  { %v224_v0 = vpop.f32.mrb[9].mxu0  ;;  %v2616_v7 = vadd.f32 %v2160_v63, %v1946_v41 }
 0x10e   :  { %v2610_v1 = vadd.f32 %v1946_v41, %v224_v0  ;;  %v261_v2 = vadd.f32 %v260_v62, %v2607_v61  ;;  %v2161_v3 = vpop.f32.mrb[10].mxu0 }
 0x10f   :  { %v227_v4 = vpop.f32.mrb[11].mxu0  ;;  %v2619_v9 = vadd.f32 %v2161_v3, %v1946_v41 }
 0x110   :  { %v262_v5 = vadd.f32 %v261_v2, %v2610_v1  ;;  %v2614_v6 = vadd.f32 %v1946_v41, %v227_v4 }
 0x112   :  { %v263_v8 = vadd.f32 %v262_v5, %v2614_v6 }
 0x114   :  { %v264_v10 = vadd.f32 %v263_v8, %v2616_v7  ;;  %v2164_v11 = vpop.f32.mrb[12].mxu0 }
 0x115   :  { %v240_v12 = vpop.f32.mrb[13].mxu0  ;;  %v2628_v19 = vadd.f32 %v2164_v11, %v1946_v41 }
 0x116   :  { %v2622_v13 = vadd.f32 %v1946_v41, %v240_v12  ;;  %v265_v14 = vadd.f32 %v264_v10, %v2619_v9  ;;  %v2165_v15 = vpop.f32.mrb[14].mxu0 }
 0x117   :  { %v243_v16 = vpop.f32.mrb[15].mxu0  ;;  %v2631_v21 = vadd.f32 %v2165_v15, %v1946_v41 }
 0x118   :  { %v266_v17 = vadd.f32 %v265_v14, %v2622_v13  ;;  %v2626_v18 = vadd.f32 %v1946_v41, %v243_v16 }
 0x11a   :  { %v267_v20 = vadd.f32 %v266_v17, %v2626_v18 }
 0x11c   :  { %v268_v22 = vadd.f32 %v267_v20, %v2628_v19 }
 0x11e   :  { %v269_v23 = vadd.f32 %v268_v22, %v2631_v21 }
 0x120   :  { %v270_v24 = vrot.slane %v269_v23, 4 }
 0x122   :  { %v271_v25 = vadd.f32 %v270_v24, %v269_v23 }
 0x124   :  { %v272_v26 = vrot.slane %v271_v25, 2 }
 0x126   :  { %v273_v27 = vadd.f32 %v272_v26, %v271_v25 }
 0x128   :  { %v274_v28 = vrot.slane %v273_v27, 1 }
 0x12a   :  { %v275_v29 = vadd.f32 %v274_v28, %v273_v27 }
 0x12c   :  { %v2635_v30 = vmul.f32 0.0078125, %v275_v29 }
 0x12e   :  { %v278_v31 = vsub.f32 %v2587_v45, %v2635_v30  ;;  %v279_v32 = vsub.f32 %v2589_v46, %v2635_v30  ;;  %v280_v33 = vsub.f32 %v2591_v47, %v2635_v30  ;;  %v281_v36 = vsub.f32 %v2595_v49, %v2635_v30 }
 0x12f   :  { %v282_v37 = vsub.f32 %v2598_v53, %v2635_v30  ;;  %v283_v40 = vsub.f32 %v2602_v58, %v2635_v30  ;;  %v284_v43 = vsub.f32 %v2604_v59, %v2635_v30  ;;  %v285_v50 = vsub.f32 %v2607_v61, %v2635_v30 }
 0x130   :  { %v294_v34 = vmul.f32 %v278_v31, %v278_v31  ;;  %v295_v35 = vmul.f32 %v279_v32, %v279_v32  ;;  %v296_v38 = vmul.f32 %v280_v33, %v280_v33  ;;  %v297_v41 = vmul.f32 %v281_v36, %v281_v36 }
 0x131   :  { %v298_v44 = vmul.f32 %v282_v37, %v282_v37  ;;  %v299_v51 = vmul.f32 %v283_v40, %v283_v40  ;;  %v286_v54 = vsub.f32 %v2610_v1, %v2635_v30  ;;  %v300_v55 = vmul.f32 %v284_v43, %v284_v43 }
 0x132   :  { %v310_v39 = vadd.f32 %v295_v35, %v294_v34  ;;  %v287_v57 = vsub.f32 %v2614_v6, %v2635_v30  ;;  %v301_v60 = vmul.f32 %v285_v50, %v285_v50  ;;  %v288_v63 = vsub.f32 %v2616_v7, %v2635_v30 }
 0x133   :  { %v302_v0 = vmul.f32 %v286_v54, %v286_v54  ;;  %v289_v3 = vsub.f32 %v2619_v9, %v2635_v30  ;;  %v290_v8 = vsub.f32 %v2622_v13, %v2635_v30  ;;  %v291_v12 = vsub.f32 %v2626_v18, %v2635_v30 }
 0x134   :  { %v311_v42 = vadd.f32 %v310_v39, %v296_v38  ;;  %v303_v4 = vmul.f32 %v287_v57, %v287_v57  ;;  %v304_v10 = vmul.f32 %v288_v63, %v288_v63  ;;  %v292_v16 = vsub.f32 %v2628_v19, %v2635_v30 }
 0x135   :  { %v305_v14 = vmul.f32 %v289_v3, %v289_v3  ;;  %v306_v17 = vmul.f32 %v290_v8, %v290_v8  ;;  %v293_v22 = vsub.f32 %v2631_v21, %v2635_v30  ;;  %v307_v23 = vmul.f32 %v291_v12, %v291_v12 }
 0x136   :  { %v312_v48 = vadd.f32 %v311_v42, %v297_v41  ;;  %v308_v25 = vmul.f32 %v292_v16, %v292_v16  ;;  %v340_v39 = vlaneseq  ;;  %v332_v41 = vld [vmem:[%s3483_s3] sm:$0x1] }
 0x137   :  { %v309_v27 = vmul.f32 %v293_v22, %v293_v22 }
 0x138   :  { %v313_v52 = vadd.f32 %v312_v48, %v298_v44  ;;  %v2669_v40 = vshrl.u32 %v340_v39, 7  ;;  %v336_v48 = vld [vmem:[%s3484_s4] sm:$0x1] }
 0x13a   :  { %v314_v56 = vadd.f32 %v313_v52, %v299_v51  ;;  %v2675_v42 = vsub.s32 0, %v2669_v40 }
 0x13c   :  { %v315_v62 = vadd.f32 %v314_v56, %v300_v55 }
 0x13e   :  { %v316_v2 = vadd.f32 %v315_v62, %v301_v60 }
 0x140   :  { %v317_v5 = vadd.f32 %v316_v2, %v302_v0 }
 0x142   :  { %v318_v11 = vadd.f32 %v317_v5, %v303_v4 }
 0x144   :  { %v319_v15 = vadd.f32 %v318_v11, %v304_v10 }
 0x146   :  { %v320_v20 = vadd.f32 %v319_v15, %v305_v14 }
 0x148   :  { %v321_v24 = vadd.f32 %v320_v20, %v306_v17 }
 0x14a   :  { %v322_v26 = vadd.f32 %v321_v24, %v307_v23 }
 0x14c   :  { %v323_v28 = vadd.f32 %v322_v26, %v308_v25 }
 0x14e   :  { %v324_v29 = vadd.f32 %v323_v28, %v309_v27 }
 0x150   :  { %v325_v31 = vrot.slane %v324_v29, 4 }
 0x152   :  { %v326_v32 = vadd.f32 %v325_v31, %v324_v29 }
 0x154   :  { %v327_v33 = vrot.slane %v326_v32, 2 }
 0x156   :  { %v328_v34 = vadd.f32 %v327_v33, %v326_v32 }
 0x158   :  { %v329_v35 = vrot.slane %v328_v34, 1 }
 0x15a   :  { %v330_v36 = vadd.f32 %v329_v35, %v328_v34 }
 0x15c   :  { %v331_v37 = vmul.f32 0.0078125, %v330_v36 }
 0x15e   :  { %v333_v38 = vadd.f32 1e-05, %v331_v37 }
 0x160   :  { %2312 = vrsqrt.f32 %v333_v38 }
 0x16a   :  { %v2313_v43 = vpop.eup %2312 }
 0x16b   :  { %v335_v44 = vmul.f32 %v2313_v43, %v332_v41 }
 0x16d   :  { %v337_v50 = vmul.f32 %v335_v44, %v2635_v30  ;;  %v343_v51 = vrot.slane %v335_v44, %v2675_v42 }
 0x16f   :  { %v338_v52 = vsub.f32 %v336_v48, %v337_v50  ;;  %v345_v54 = vmul.f32 %v343_v51, %v2587_v45  ;;  %v346_v56 = vmul.f32 %v343_v51, %v2589_v46  ;;  %v347_v57 = vmul.f32 %v343_v51, %v2591_v47  ;;  %v2264_v50 = vld [vmem:[%s3485_s9] sm:$0xff]  }
 0x170   :  { %v348_v60 = vmul.f32 %v343_v51, %v2595_v49  ;;  %v349_v62 = vmul.f32 %v343_v51, %v2598_v53  ;;  %v350_v63 = vmul.f32 %v343_v51, %v2602_v58  ;;  %v351_v47 = vmul.f32 %v343_v51, %v2604_v59  ;;  %2198 = vmatprep.subr.bf16.mxu0 %v2264_v50 }
 0x171   :  { %v365_v55 = vrot.slane %v338_v52, %v2675_v42  ;;  %v352_v49 = vmul.f32 %v343_v51, %v2607_v61  ;;  %v353_v58 = vmul.f32 %v343_v51, %v2610_v1  ;;  %v354_v15 = vmul.f32 %v343_v51, %v2614_v6  ;;  %2199 = vmatpush3.bf16.msra.mxu0 %v2264_v50  ;;  %v2268_v52 = vld [vmem:[%s3485_s9 + $0x20] sm:$0xff]  }
 0x172   :  { %v355_v61 = vmul.f32 %v343_v51, %v2616_v7  ;;  %v356_v27 = vmul.f32 %v343_v51, %v2619_v9  ;;  %v358_v1 = vmul.f32 %v343_v51, %v2626_v18  ;;  %v357_v6 = vmul.f32 %v343_v51, %v2622_v13 }
 0x173   :  { %v367_v0 = vadd.f32 %v365_v55, %v345_v54  ;;  %v368_v2 = vadd.f32 %v365_v55, %v346_v56  ;;  %v369_v30 = vadd.f32 %v365_v55, %v347_v57  ;;  %v370_v3 = vadd.f32 %v365_v55, %v348_v60  ;;  %v2269_v54 = vld [vmem:[%s3485_s9 + $0x28] sm:$0xff]   ;;  %v2271_v56 = vld [vmem:[%s3485_s9 + $0x38] sm:$0xff]   ;;  %v1955_v60 = vld [vmem:[%s3486_s6] ss:$0 sm:$0xff] }
 0x174   :  { %v371_v4 = vadd.f32 %v365_v55, %v349_v62  ;;  %v372_v5 = vadd.f32 %v365_v55, %v350_v63  ;;  %v373_v16 = vadd.f32 %v365_v55, %v351_v47  ;;  %v374_v17 = vadd.f32 %v365_v55, %v352_v49 }
 0x175   :  { %v383_v8 = vmax.f32 %v367_v0, 0.0  ;;  %v384_v45 = vmax.f32 %v368_v2, 0.0  ;;  %v385_v10 = vmax.f32 %v369_v30, 0.0  ;;  %v386_v11 = vmax.f32 %v370_v3, 0.0 }
 0x176   :  { %v387_v12 = vmax.f32 %v371_v4, 0.0  ;;  %v388_v46 = vmax.f32 %v372_v5, 0.0  ;;  %v375_v22 = vadd.f32 %v365_v55, %v353_v58  ;;  %v376_v23 = vadd.f32 %v365_v55, %v354_v15 }
 0x177   :  { %v399_v14 = vpack.c.bf16 %v384_v45, %v383_v8  ;;  %v400_v53 = vpack.c.bf16 %v386_v11, %v385_v10  ;;  %v389_v24 = vmax.f32 %v373_v16, 0.0  ;;  %v390_v25 = vmax.f32 %v374_v17, 0.0 }
 0x178   :  { %v401_v20 = vpack.c.bf16 %v388_v46, %v387_v12  ;;  %v391_v26 = vmax.f32 %v375_v22, 0.0  ;;  %v392_v59 = vmax.f32 %v376_v23, 0.0  ;;  %v377_v29 = vadd.f32 %v365_v55, %v355_v61 }
 0x179   :  { %2182 = vmatprep.mubr.bf16.mxu1 %v399_v14  ;;  %v402_v28 = vpack.c.bf16 %v390_v25, %v389_v24  ;;  %v378_v31 = vadd.f32 %v365_v55, %v356_v27  ;;  %v379_v33 = vadd.f32 %v365_v55, %v357_v6  ;;  %v380_v34 = vadd.f32 %v365_v55, %v358_v1 }
 0x17a   :  { %2183 = vmatmul.mubr.bf16.vlgmr.msra.gmra.mrb[0].mxu1 %v400_v53  ;;  %v403_v32 = vpack.c.bf16 %v392_v59, %v391_v26  ;;  %v393_v35 = vmax.f32 %v377_v29, 0.0  ;;  %v359_v7 = vmul.f32 %v343_v51, %v2628_v19  ;;  %v360_v9 = vmul.f32 %v343_v51, %v2631_v21  ;;  %v2265_v19 = vld [vmem:[%s3485_s9 + $0x8] sm:$0xff]   ;;  %v2266_v21 = vld [vmem:[%s3485_s9 + $0x10] sm:$0xff]   ;;  %v2267_v51 = vld [vmem:[%s3485_s9 + $0x18] sm:$0xff]  }
 0x17b   :  { %2186 = vmatprep.mubr.bf16.mxu1 %v401_v20  ;;  %v394_v36 = vmax.f32 %v378_v31, 0.0  ;;  %v395_v37 = vmax.f32 %v379_v33, 0.0  ;;  %v396_v38 = vmax.f32 %v380_v34, 0.0  ;;  %2200 = vmatprep.subr.bf16.mxu0 %v2265_v19 }
 0x17c   :  { %v381_v18 = vadd.f32 %v365_v55, %v359_v7  ;;  %v382_v41 = vadd.f32 %v365_v55, %v360_v9  ;;  %2201 = vmatpush3.bf16.msra.mxu0 %v2265_v19  ;;  %v2270_v55 = vld [vmem:[%s3485_s9 + $0x30] sm:$0xff]  }
 0x17d   :  { %v404_v39 = vpack.c.bf16 %v394_v36, %v393_v35  ;;  %v405_v13 = vpack.c.bf16 %v396_v38, %v395_v37  ;;  %2202 = vmatprep.subr.bf16.mxu0 %v2266_v21 }
 0x17e   :  { %v397_v43 = vmax.f32 %v381_v18, 0.0  ;;  %v398_v44 = vmax.f32 %v382_v41, 0.0 }
 0x180   :  { %v406_v48 = vpack.c.bf16 %v398_v44, %v397_v43  ;;  %2203 = vmatpush3.bf16.msra.mxu0 %v2266_v21 }
 0x181   :  { %2204 = vmatprep.subr.bf16.mxu0 %v2267_v51 }
 0x182   :  { %2187 = vmatmul.mubr.bf16.gmra.mrb[4].mxu1 %v402_v28 }
 0x183   :  { %2190 = vmatprep.mubr.bf16.mxu1 %v403_v32 }
 0x184   :  { %2205 = vmatpush3.bf16.msra.mxu0 %v2267_v51 }
 0x185   :  { %2206 = vmatprep.subr.bf16.mxu0 %v2268_v52 }
 0x188   :  { %2207 = vmatpush3.bf16.msra.mxu0 %v2268_v52 }
 0x189   :  { %2208 = vmatprep.subr.bf16.mxu0 %v2269_v54 }
 0x18a   :  { %2191 = vmatmul.mubr.bf16.gmra.mrb[8].mxu1 %v404_v39 }
 0x18b   :  { %2194 = vmatprep.mubr.bf16.mxu1 %v405_v13 }
 0x18c   :  { %2209 = vmatpush3.bf16.msra.mxu0 %v2269_v54 }
 0x18d   :  { %2210 = vmatprep.subr.bf16.mxu0 %v2270_v55 }
 0x190   :  { %2211 = vmatpush3.bf16.msra.mxu0 %v2270_v55 }
 0x191   :  { %2212 = vmatprep.subr.bf16.mxu0 %v2271_v56 }
 0x192   :  { %2195 = vmatmul.mubr.bf16.gmra.mrb[12].mxu1 %v406_v48 }
 0x194   :  { %2213 = vmatpush3.bf16.msra.mxu0 %v2271_v56 }
 0x24d   :  { %v2184_v57 = vpop.f32.mrb[0].mxu1 }
 0x24e   :  { %v512_v62 = vpop.f32.mrb[1].mxu1  ;;  %v2730_v3 = vadd.f32 %v2184_v57, %v1955_v60 }
 0x24f   :  { %v2185_v63 = vpop.f32.mrb[2].mxu1  ;;  %v2726_v2 = vadd.f32 %v1955_v60, %v512_v62 }
 0x250   :  { %v515_v0 = vpop.f32.mrb[3].mxu1  ;;  %v2734_v5 = vadd.f32 %v2185_v63, %v1955_v60 }
 0x251   :  { %v2728_v30 = vadd.f32 %v1955_v60, %v515_v0 }
 0x253   :  { %v575_v4 = vadd.f32 %v2728_v30, %v2726_v2 }
 0x255   :  { %v576_v8 = vadd.f32 %v575_v4, %v2730_v3  ;;  %v2188_v45 = vpop.f32.mrb[4].mxu1 }
 0x256   :  { %v528_v10 = vpop.f32.mrb[5].mxu1  ;;  %v2743_v53 = vadd.f32 %v2188_v45, %v1955_v60 }
 0x257   :  { %v2737_v11 = vadd.f32 %v1955_v60, %v528_v10  ;;  %v577_v12 = vadd.f32 %v576_v8, %v2734_v5  ;;  %v2189_v46 = vpop.f32.mrb[6].mxu1 }
 0x258   :  { %v531_v47 = vpop.f32.mrb[7].mxu1  ;;  %v2746_v15 = vadd.f32 %v2189_v46, %v1955_v60 }
 0x259   :  { %v578_v49 = vadd.f32 %v577_v12, %v2737_v11  ;;  %v2741_v14 = vadd.f32 %v1955_v60, %v531_v47 }
 0x25b   :  { %v579_v58 = vadd.f32 %v578_v49, %v2741_v14 }
 0x25d   :  { %v580_v16 = vadd.f32 %v579_v58, %v2743_v53  ;;  %v2192_v17 = vpop.f32.mrb[8].mxu1 }
 0x25e   :  { %v544_v20 = vpop.f32.mrb[9].mxu1  ;;  %v2755_v61 = vadd.f32 %v2192_v17, %v1955_v60 }
 0x25f   :  { %v2749_v22 = vadd.f32 %v1955_v60, %v544_v20  ;;  %v581_v23 = vadd.f32 %v580_v16, %v2746_v15  ;;  %v2193_v24 = vpop.f32.mrb[10].mxu1 }
 0x260   :  { %v547_v25 = vpop.f32.mrb[11].mxu1  ;;  %v2758_v1 = vadd.f32 %v2193_v24, %v1955_v60 }
 0x261   :  { %v582_v26 = vadd.f32 %v581_v23, %v2749_v22  ;;  %v2753_v59 = vadd.f32 %v1955_v60, %v547_v25 }
 0x263   :  { %v583_v27 = vadd.f32 %v582_v26, %v2753_v59 }
 0x265   :  { %v584_v6 = vadd.f32 %v583_v27, %v2755_v61  ;;  %v2196_v28 = vpop.f32.mrb[12].mxu1 }
 0x266   :  { %v560_v29 = vpop.f32.mrb[13].mxu1  ;;  %v2767_v37 = vadd.f32 %v2196_v28, %v1955_v60 }
 0x267   :  { %v2761_v31 = vadd.f32 %v1955_v60, %v560_v29  ;;  %v585_v32 = vadd.f32 %v584_v6, %v2758_v1  ;;  %v2197_v33 = vpop.f32.mrb[14].mxu1 }
 0x268   :  { %v563_v34 = vpop.f32.mrb[15].mxu1  ;;  %v2770_v7 = vadd.f32 %v2197_v33, %v1955_v60 }
 0x269   :  { %v586_v35 = vadd.f32 %v585_v32, %v2761_v31  ;;  %v2765_v36 = vadd.f32 %v1955_v60, %v563_v34 }
 0x26b   :  { %v587_v38 = vadd.f32 %v586_v35, %v2765_v36 }
 0x26d   :  { %v588_v9 = vadd.f32 %v587_v38, %v2767_v37 }
 0x26f   :  { %v589_v39 = vadd.f32 %v588_v9, %v2770_v7 }
 0x271   :  { %v590_v18 = vrot.slane %v589_v39, 4 }
 0x273   :  { %v591_v41 = vadd.f32 %v590_v18, %v589_v39 }
 0x275   :  { %v592_v13 = vrot.slane %v591_v41, 2 }
 0x277   :  { %v593_v43 = vadd.f32 %v592_v13, %v591_v41 }
 0x279   :  { %v594_v44 = vrot.slane %v593_v43, 1 }
 0x27b   :  { %v595_v48 = vadd.f32 %v594_v44, %v593_v43 }
 0x27d   :  { %v2774_v50 = vmul.f32 0.0078125, %v595_v48 }
 0x27f   :  { %v597_v19 = vsub.f32 %v2726_v2, %v2774_v50  ;;  %v598_v21 = vsub.f32 %v2728_v30, %v2774_v50  ;;  %v599_v51 = vsub.f32 %v2730_v3, %v2774_v50  ;;  %v600_v55 = vsub.f32 %v2734_v5, %v2774_v50 }
 0x280   :  { %v601_v56 = vsub.f32 %v2737_v11, %v2774_v50  ;;  %v602_v62 = vsub.f32 %v2741_v14, %v2774_v50  ;;  %v603_v4 = vsub.f32 %v2743_v53, %v2774_v50  ;;  %v604_v10 = vsub.f32 %v2746_v15, %v2774_v50 }
 0x281   :  { %v613_v52 = vmul.f32 %v597_v19, %v597_v19  ;;  %v614_v54 = vmul.f32 %v598_v21, %v598_v21  ;;  %v615_v57 = vmul.f32 %v599_v51, %v599_v51  ;;  %v616_v63 = vmul.f32 %v600_v55, %v600_v55 }
 0x282   :  { %v617_v8 = vmul.f32 %v601_v56, %v601_v56  ;;  %v618_v12 = vmul.f32 %v602_v62, %v602_v62  ;;  %v605_v47 = vsub.f32 %v2749_v22, %v2774_v50  ;;  %v619_v49 = vmul.f32 %v603_v4, %v603_v4 }
 0x283   :  { %v629_v60 = vadd.f32 %v614_v54, %v613_v52  ;;  %v606_v16 = vsub.f32 %v2753_v59, %v2774_v50  ;;  %v620_v17 = vmul.f32 %v604_v10, %v604_v10  ;;  %v607_v23 = vsub.f32 %v2755_v61, %v2774_v50 }
 0x284   :  { %v621_v24 = vmul.f32 %v605_v47, %v605_v47  ;;  %v608_v26 = vsub.f32 %v2758_v1, %v2774_v50  ;;  %v609_v28 = vsub.f32 %v2761_v31, %v2774_v50  ;;  %v610_v33 = vsub.f32 %v2765_v36, %v2774_v50 }
 0x285   :  { %v630_v0 = vadd.f32 %v629_v60, %v615_v57  ;;  %v622_v27 = vmul.f32 %v606_v16, %v606_v16  ;;  %v623_v29 = vmul.f32 %v607_v23, %v607_v23  ;;  %v611_v38 = vsub.f32 %v2767_v37, %v2774_v50 }
 0x286   :  { %v624_v34 = vmul.f32 %v608_v26, %v608_v26  ;;  %v625_v9 = vmul.f32 %v609_v28, %v609_v28  ;;  %v612_v18 = vsub.f32 %v2770_v7, %v2774_v50  ;;  %v626_v41 = vmul.f32 %v610_v33, %v610_v33 }
 0x287   :  { %v631_v45 = vadd.f32 %v630_v0, %v616_v63  ;;  %v627_v43 = vmul.f32 %v611_v38, %v611_v38  ;;  %v651_v63 = vld [vmem:[%s3487_s7] sm:$0x1] }
 0x288   :  { %v628_v48 = vmul.f32 %v612_v18, %v612_v18 }
 0x289   :  { %v632_v46 = vadd.f32 %v631_v45, %v617_v8  ;;  %v655_v8 = vld [vmem:[%s3488_s8] sm:$0x1] }
 0x28b   :  { %v633_v58 = vadd.f32 %v632_v46, %v618_v12 }
 0x28d   :  { %v634_v20 = vadd.f32 %v633_v58, %v619_v49 }
 0x28f   :  { %v635_v25 = vadd.f32 %v634_v20, %v620_v17 }
 0x291   :  { %v636_v6 = vadd.f32 %v635_v25, %v621_v24 }
 0x293   :  { %v637_v32 = vadd.f32 %v636_v6, %v622_v27 }
 0x295   :  { %v638_v35 = vadd.f32 %v637_v32, %v623_v29 }
 0x297   :  { %v639_v39 = vadd.f32 %v638_v35, %v624_v34 }
 0x299   :  { %v640_v13 = vadd.f32 %v639_v39, %v625_v9 }
 0x29b   :  { %v641_v44 = vadd.f32 %v640_v13, %v626_v41 }
 0x29d   :  { %v642_v19 = vadd.f32 %v641_v44, %v627_v43 }
 0x29f   :  { %v643_v21 = vadd.f32 %v642_v19, %v628_v48 }
 0x2a1   :  { %v644_v51 = vrot.slane %v643_v21, 4 }
 0x2a3   :  { %v645_v52 = vadd.f32 %v644_v51, %v643_v21 }
 0x2a5   :  { %v646_v54 = vrot.slane %v645_v52, 2 }
 0x2a7   :  { %v647_v55 = vadd.f32 %v646_v54, %v645_v52 }
 0x2a9   :  { %v648_v56 = vrot.slane %v647_v55, 1 }
 0x2ab   :  { %v649_v57 = vadd.f32 %v648_v56, %v647_v55 }
 0x2ad   :  { %v650_v60 = vmul.f32 0.0078125, %v649_v57 }
 0x2af   :  { %v652_v62 = vadd.f32 1e-05, %v650_v60 }
 0x2b1   :  { %2314 = vrsqrt.f32 %v652_v62 }
 0x2bb   :  { %v2315_v0 = vpop.eup %2314 }
 0x2bc   :  { %v654_v4 = vmul.f32 %v2315_v0, %v651_v63 }
 0x2be   :  { %v656_v45 = vmul.f32 %v654_v4, %v2774_v50  ;;  %v662_v10 = vrot.slane %v654_v4, %v2675_v42 }
 0x2c0   :  { %v657_v12 = vsub.f32 %v655_v8, %v656_v45  ;;  %v664_v46 = vmul.f32 %v662_v10, %v2726_v2  ;;  %v665_v49 = vmul.f32 %v662_v10, %v2728_v30  ;;  %v666_v58 = vmul.f32 %v662_v10, %v2730_v3  ;;  %v2274_v45 = vld [vmem:[%s3489_s13 + $0x4] ss:$8 sps:$4 sm:$0xff]  }
 0x2c1   :  { %v667_v16 = vmul.f32 %v662_v10, %v2734_v5  ;;  %v668_v17 = vmul.f32 %v662_v10, %v2737_v11  ;;  %v669_v20 = vmul.f32 %v662_v10, %v2741_v14  ;;  %v670_v3 = vmul.f32 %v662_v10, %v2743_v53  ;;  %1153 = vmatprep.subr.bf16.mxu1 %v2274_v45 }
 0x2c2   :  { %v684_v47 = vrot.slane %v657_v12, %v2675_v42  ;;  %v671_v5 = vmul.f32 %v662_v10, %v2746_v15  ;;  %v672_v14 = vmul.f32 %v662_v10, %v2749_v22  ;;  %v673_v34 = vmul.f32 %v662_v10, %v2753_v59  ;;  %v2280_v12 = vld [vmem:[%s3489_s13 + $0x24] ss:$8 sps:$4 sm:$0xff]  }
 0x2c3   :  { %v674_v15 = vmul.f32 %v662_v10, %v2755_v61  ;;  %v675_v44 = vmul.f32 %v662_v10, %v2758_v1  ;;  %v677_v22 = vmul.f32 %v662_v10, %v2765_v36  ;;  %v676_v59 = vmul.f32 %v662_v10, %v2761_v31 }
 0x2c4   :  { %v686_v23 = vadd.f32 %v684_v47, %v664_v46  ;;  %v687_v24 = vadd.f32 %v684_v47, %v665_v49  ;;  %v688_v50 = vadd.f32 %v684_v47, %v666_v58  ;;  %v689_v25 = vadd.f32 %v684_v47, %v667_v16  ;;  %v2278_v46 = vld [vmem:[%s3489_s13 + $0x20] ss:$8 sps:$4 sm:$0xff]   ;;  %v2281_v49 = vld [vmem:[%s3489_s13 + $0x30] ss:$8 sps:$4 sm:$0xff]   ;;  %v2286_v58 = vld [vmem:[%s3489_s13 + $0x44] ss:$8 sps:$4 sm:$0xff]  }
 0x2c5   :  { %v690_v26 = vadd.f32 %v684_v47, %v668_v17  ;;  %v691_v27 = vadd.f32 %v684_v47, %v669_v20  ;;  %v692_v35 = vadd.f32 %v684_v47, %v670_v3  ;;  %v693_v38 = vadd.f32 %v684_v47, %v671_v5  ;;  %v2284_v16 = vld [vmem:[%s3489_s13 + $0x40] ss:$8 sps:$4 sm:$0xff]   ;;  %v2287_v17 = vld [vmem:[%s3489_s13 + $0x50] ss:$8 sps:$4 sm:$0xff]   ;;  %v2289_v20 = vld [vmem:[%s3489_s13 + $0x54] ss:$8 sps:$4 sm:$0xff]  }
 0x2c6   :  { %v702_v6 = vmax.f32 %v686_v23, 0.0  ;;  %v703_v2 = vmax.f32 %v687_v24, 0.0  ;;  %v704_v28 = vmax.f32 %v688_v50, 0.0  ;;  %v705_v29 = vmax.f32 %v689_v25, 0.0  ;;  %v2292_v23 = vld [vmem:[%s3489_s13 + $0x64] ss:$8 sps:$4 sm:$0xff]  }
 0x2c7   :  { %v706_v32 = vmax.f32 %v690_v26, 0.0  ;;  %v707_v30 = vmax.f32 %v691_v27, 0.0  ;;  %v694_v39 = vadd.f32 %v684_v47, %v672_v14  ;;  %v695_v18 = vadd.f32 %v684_v47, %v673_v34  ;;  %v2290_v50 = vld [vmem:[%s3489_s13 + $0x60] ss:$8 sps:$4 sm:$0xff]   ;;  %v2295_v25 = vld [vmem:[%s3489_s13 + $0x74] ss:$8 sps:$4 sm:$0xff]  }
 0x2c8   :  { %v718_v33 = vpack.c.bf16 %v703_v2, %v702_v6  ;;  %v719_v11 = vpack.c.bf16 %v705_v29, %v704_v28  ;;  %v708_v41 = vmax.f32 %v692_v35, 0.0  ;;  %v709_v13 = vmax.f32 %v693_v38, 0.0  ;;  %v1964_v27 = vld [vmem:[%s3490_s10] ss:$0 sm:$0xff]  ;;  %v2293_v2 = vld [vmem:[%s3489_s13 + $0x70] ss:$8 sps:$4 sm:$0xff]  }
 0x2c9   :  { %v720_v9 = vpack.c.bf16 %v707_v30, %v706_v32  ;;  %v710_v43 = vmax.f32 %v694_v39, 0.0  ;;  %v711_v53 = vmax.f32 %v695_v18, 0.0  ;;  %v696_v19 = vadd.f32 %v684_v47, %v674_v15 }
 0x2ca   :  { %2214 = vmatprep.mubr.bf16.mxu0 %v718_v33  ;;  %v721_v48 = vpack.c.bf16 %v709_v13, %v708_v41  ;;  %v697_v21 = vadd.f32 %v684_v47, %v675_v44  ;;  %v698_v52 = vadd.f32 %v684_v47, %v676_v59  ;;  %v699_v54 = vadd.f32 %v684_v47, %v677_v22 }
 0x2cb   :  { %2215 = vmatmul.mubr.bf16.vlgmr.msra.gmra.mrb[16].mxu0 %v719_v11  ;;  %v722_v51 = vpack.c.bf16 %v711_v53, %v710_v43  ;;  %v712_v55 = vmax.f32 %v696_v19, 0.0  ;;  %v678_v61 = vmul.f32 %v662_v10, %v2767_v37  ;;  %v679_v1 = vmul.f32 %v662_v10, %v2770_v7  ;;  %v2272_v37 = vld [vmem:[%s3489_s13] ss:$8 sps:$4 sm:$0xff]   ;;  %v2277_v7 = vld [vmem:[%s3489_s13 + $0x14] ss:$8 sps:$4 sm:$0xff]  }
 0x2cc   :  { %2218 = vmatprep.mubr.bf16.mxu0 %v720_v9  ;;  %v713_v56 = vmax.f32 %v697_v21, 0.0  ;;  %v714_v57 = vmax.f32 %v698_v52, 0.0  ;;  %v715_v60 = vmax.f32 %v699_v54, 0.0  ;;  %1154 = vmatpush1.bf16.msra.mxu1 %v2272_v37  ;;  %v2275_v10 = vld [vmem:[%s3489_s13 + $0x10] ss:$8 sps:$4 sm:$0xff]   ;;  %v2386_v24 = vmov 0  }
 0x2cd   :  { %v700_v36 = vadd.f32 %v684_v47, %v678_v61  ;;  %v701_v63 = vadd.f32 %v684_v47, %v679_v1  ;;  %1155 = vmatprep.subr.bf16.mxu1 %v2277_v7  ;;  %v2283_v47 = vld [vmem:[%s3489_s13 + $0x34] ss:$8 sps:$4 sm:$0xff]   ;;  %1185 = vmatprep.mubr.bf16.mxu1 %v2386_v24 }
 0x2ce   :  { %v723_v62 = vpack.c.bf16 %v713_v56, %v712_v55  ;;  %v724_v31 = vpack.c.bf16 %v715_v60, %v714_v57 }
 0x2cf   :  { %v716_v0 = vmax.f32 %v700_v36, 0.0  ;;  %v717_v4 = vmax.f32 %v701_v63, 0.0 }
 0x2d0   :  { %1156 = vmatpush1.bf16.msra.mxu1 %v2275_v10 }
 0x2d1   :  { %v725_v8 = vpack.c.bf16 %v717_v4, %v716_v0  ;;  %1157 = vmatprep.subr.bf16.mxu1 %v2280_v12 }
 0x2d3   :  { %2219 = vmatmul.mubr.bf16.gmra.mrb[20].mxu0 %v721_v48 }
 0x2d4   :  { %2222 = vmatprep.mubr.bf16.mxu0 %v722_v51  ;;  %1158 = vmatpush1.bf16.msra.mxu1 %v2278_v46 }
 0x2d5   :  { %1159 = vmatprep.subr.bf16.mxu1 %v2283_v47 }
 0x2d8   :  { %1160 = vmatpush1.bf16.msra.mxu1 %v2281_v49 }
 0x2d9   :  { %1161 = vmatprep.subr.bf16.mxu1 %v2286_v58 }
 0x2db   :  { %2223 = vmatmul.mubr.bf16.gmra.mrb[24].mxu0 %v723_v62 }
 0x2dc   :  { %2226 = vmatprep.mubr.bf16.mxu0 %v724_v31  ;;  %1162 = vmatpush1.bf16.msra.mxu1 %v2284_v16 }
 0x2dd   :  { %1163 = vmatprep.subr.bf16.mxu1 %v2289_v20 }
 0x2e0   :  { %1164 = vmatpush1.bf16.msra.mxu1 %v2287_v17 }
 0x2e1   :  { %1165 = vmatprep.subr.bf16.mxu1 %v2292_v23 }
 0x2e3   :  { %2227 = vmatmul.mubr.bf16.gmra.mrb[28].mxu0 %v725_v8 }
 0x2e4   :  { %1166 = vmatpush1.bf16.msra.mxu1 %v2290_v50 }
 0x2e5   :  { %1167 = vmatprep.subr.bf16.mxu1 %v2295_v25 }
 0x2e8   :  { %1168 = vmatpush1.bf16.msra.mxu1 %v2293_v2 }
 0x39e   :  { %v2216_v26 = vpop.f32.mrb[16].mxu0 }
 0x39f   :  { %v831_v6 = vpop.f32.mrb[17].mxu0  ;;  %v2889_v3 = vadd.f32 %v2216_v26, %v1964_v27 }
 0x3a0   :  { %v2217_v28 = vpop.f32.mrb[18].mxu0  ;;  %v2885_v32 = vadd.f32 %v1964_v27, %v831_v6 }
 0x3a1   :  { %v834_v29 = vpop.f32.mrb[19].mxu0  ;;  %v2893_v33 = vadd.f32 %v2217_v28, %v1964_v27 }
 0x3a2   :  { %v2887_v30 = vadd.f32 %v1964_v27, %v834_v29 }
 0x3a4   :  { %v894_v5 = vadd.f32 %v2887_v30, %v2885_v32 }
 0x3a6   :  { %v895_v11 = vadd.f32 %v894_v5, %v2889_v3  ;;  %v2220_v14 = vpop.f32.mrb[20].mxu0 }
 0x3a7   :  { %v847_v34 = vpop.f32.mrb[21].mxu0  ;;  %v2902_v13 = vadd.f32 %v2220_v14, %v1964_v27 }
 0x3a8   :  { %v2896_v35 = vadd.f32 %v1964_v27, %v847_v34  ;;  %v896_v38 = vadd.f32 %v895_v11, %v2893_v33  ;;  %v2221_v9 = vpop.f32.mrb[22].mxu0 }
 0x3a9   :  { %v850_v39 = vpop.f32.mrb[23].mxu0  ;;  %v2905_v53 = vadd.f32 %v2221_v9, %v1964_v27 }
 0x3aa   :  { %v897_v18 = vadd.f32 %v896_v38, %v2896_v35  ;;  %v2900_v41 = vadd.f32 %v1964_v27, %v850_v39 }
 0x3ac   :  { %v898_v43 = vadd.f32 %v897_v18, %v2900_v41 }
 0x3ae   :  { %v899_v15 = vadd.f32 %v898_v43, %v2902_v13  ;;  %v2224_v44 = vpop.f32.mrb[24].mxu0 }
 0x3af   :  { %v863_v22 = vpop.f32.mrb[25].mxu0  ;;  %v2914_v54 = vadd.f32 %v2224_v44, %v1964_v27 }
 0x3b0   :  { %v2908_v59 = vadd.f32 %v1964_v27, %v863_v22  ;;  %v900_v48 = vadd.f32 %v899_v15, %v2905_v53  ;;  %v2225_v19 = vpop.f32.mrb[26].mxu0 }
 0x3b1   :  { %v866_v21 = vpop.f32.mrb[27].mxu0  ;;  %v2917_v56 = vadd.f32 %v2225_v19, %v1964_v27 }
 0x3b2   :  { %v901_v51 = vadd.f32 %v900_v48, %v2908_v59  ;;  %v2912_v52 = vadd.f32 %v1964_v27, %v866_v21 }
 0x3b4   :  { %v902_v55 = vadd.f32 %v901_v51, %v2912_v52 }
 0x3b6   :  { %v903_v57 = vadd.f32 %v902_v55, %v2914_v54  ;;  %v2228_v60 = vpop.f32.mrb[28].mxu0 }
 0x3b7   :  { %v879_v61 = vpop.f32.mrb[29].mxu0  ;;  %v2926_v4 = vadd.f32 %v2228_v60, %v1964_v27 }
 0x3b8   :  { %v2920_v1 = vadd.f32 %v1964_v27, %v879_v61  ;;  %v904_v62 = vadd.f32 %v903_v57, %v2917_v56  ;;  %v2229_v36 = vpop.f32.mrb[30].mxu0 }
 0x3b9   :  { %v882_v63 = vpop.f32.mrb[31].mxu0  ;;  %v2929_v45 = vadd.f32 %v2229_v36, %v1964_v27 }
 0x3ba   :  { %v905_v31 = vadd.f32 %v904_v62, %v2920_v1  ;;  %v2924_v0 = vadd.f32 %v1964_v27, %v882_v63 }
 0x3bc   :  { %v906_v8 = vadd.f32 %v905_v31, %v2924_v0 }
 0x3be   :  { %v907_v37 = vadd.f32 %v906_v8, %v2926_v4 }
 0x3c0   :  { %v908_v7 = vadd.f32 %v907_v37, %v2929_v45 }
 0x3c2   :  { %v909_v10 = vrot.slane %v908_v7, 4 }
 0x3c4   :  { %v910_v12 = vadd.f32 %v909_v10, %v908_v7 }
 0x3c6   :  { %v911_v46 = vrot.slane %v910_v12, 2 }
 0x3c8   :  { %v912_v47 = vadd.f32 %v911_v46, %v910_v12 }
 0x3ca   :  { %v913_v49 = vrot.slane %v912_v47, 1 }
 0x3cc   :  { %v914_v58 = vadd.f32 %v913_v49, %v912_v47 }
 0x3ce   :  { %v2933_v16 = vmul.f32 0.0078125, %v914_v58 }
 0x3d0   :  { %v916_v17 = vsub.f32 %v2885_v32, %v2933_v16  ;;  %v917_v20 = vsub.f32 %v2887_v30, %v2933_v16  ;;  %v918_v23 = vsub.f32 %v2889_v3, %v2933_v16  ;;  %v919_v26 = vsub.f32 %v2893_v33, %v2933_v16 }
 0x3d1   :  { %v920_v27 = vsub.f32 %v2896_v35, %v2933_v16  ;;  %v921_v28 = vsub.f32 %v2900_v41, %v2933_v16  ;;  %v922_v11 = vsub.f32 %v2902_v13, %v2933_v16  ;;  %v923_v38 = vsub.f32 %v2905_v53, %v2933_v16 }
 0x3d2   :  { %v932_v50 = vmul.f32 %v916_v17, %v916_v17  ;;  %v933_v25 = vmul.f32 %v917_v20, %v917_v20  ;;  %v934_v6 = vmul.f32 %v918_v23, %v918_v23  ;;  %v935_v29 = vmul.f32 %v919_v26, %v919_v26 }
 0x3d3   :  { %v936_v14 = vmul.f32 %v920_v27, %v920_v27  ;;  %v937_v9 = vmul.f32 %v921_v28, %v921_v28  ;;  %v924_v18 = vsub.f32 %v2908_v59, %v2933_v16  ;;  %v938_v43 = vmul.f32 %v922_v11, %v922_v11 }
 0x3d4   :  { %v948_v2 = vadd.f32 %v933_v25, %v932_v50  ;;  %v925_v44 = vsub.f32 %v2912_v52, %v2933_v16  ;;  %v939_v22 = vmul.f32 %v923_v38, %v923_v38  ;;  %v926_v19 = vsub.f32 %v2914_v54, %v2933_v16 }
 0x3d5   :  { %v940_v21 = vmul.f32 %v924_v18, %v924_v18  ;;  %v927_v55 = vsub.f32 %v2917_v56, %v2933_v16  ;;  %v928_v61 = vsub.f32 %v2920_v1, %v2933_v16  ;;  %v929_v63 = vsub.f32 %v2924_v0, %v2933_v16 }
 0x3d6   :  { %v949_v5 = vadd.f32 %v948_v2, %v934_v6  ;;  %v941_v57 = vmul.f32 %v925_v44, %v925_v44  ;;  %v942_v62 = vmul.f32 %v926_v19, %v926_v19  ;;  %v930_v37 = vsub.f32 %v2926_v4, %v2933_v16 }
 0x3d7   :  { %v943_v31 = vmul.f32 %v927_v55, %v927_v55  ;;  %v944_v7 = vmul.f32 %v928_v61, %v928_v61  ;;  %v931_v12 = vsub.f32 %v2929_v45, %v2933_v16  ;;  %v945_v46 = vmul.f32 %v929_v63, %v929_v63 }
 0x3d8   :  { %v950_v34 = vadd.f32 %v949_v5, %v935_v29  ;;  %v946_v49 = vmul.f32 %v930_v37, %v930_v37  ;;  %v970_v5 = vld [vmem:[%s3491_s11] sm:$0x1] }
 0x3d9   :  { %v947_v17 = vmul.f32 %v931_v12, %v931_v12 }
 0x3da   :  { %v951_v39 = vadd.f32 %v950_v34, %v936_v14  ;;  %v974_v34 = vld [vmem:[%s3492_s12] sm:$0x1] }
 0x3dc   :  { %v952_v15 = vadd.f32 %v951_v39, %v937_v9 }
 0x3de   :  { %v953_v48 = vadd.f32 %v952_v15, %v938_v43 }
 0x3e0   :  { %v954_v51 = vadd.f32 %v953_v48, %v939_v22 }
 0x3e2   :  { %v955_v60 = vadd.f32 %v954_v51, %v940_v21 }
 0x3e4   :  { %v956_v36 = vadd.f32 %v955_v60, %v941_v57 }
 0x3e6   :  { %v957_v8 = vadd.f32 %v956_v36, %v942_v62 }
 0x3e8   :  { %v958_v10 = vadd.f32 %v957_v8, %v943_v31 }
 0x3ea   :  { %v959_v47 = vadd.f32 %v958_v10, %v944_v7 }
 0x3ec   :  { %v960_v58 = vadd.f32 %v959_v47, %v945_v46 }
 0x3ee   :  { %v961_v20 = vadd.f32 %v960_v58, %v946_v49 }
 0x3f0   :  { %v962_v23 = vadd.f32 %v961_v20, %v947_v17 }
 0x3f2   :  { %v963_v50 = vrot.slane %v962_v23, 4 }
 0x3f4   :  { %v964_v25 = vadd.f32 %v963_v50, %v962_v23 }
 0x3f6   :  { %v965_v26 = vrot.slane %v964_v25, 2 }
 0x3f8   :  { %v966_v27 = vadd.f32 %v965_v26, %v964_v25 }
 0x3fa   :  { %v967_v6 = vrot.slane %v966_v27, 1 }
 0x3fc   :  { %v968_v2 = vadd.f32 %v967_v6, %v966_v27 }
 0x3fe   :  { %v969_v28 = vmul.f32 0.0078125, %v968_v2 }
 0x400   :  { %v971_v29 = vadd.f32 1e-05, %v969_v28 }
 0x402   :  { %2316 = vrsqrt.f32 %v971_v29 }
 0x40c   :  { %v2317_v11 = vpop.eup %2316 }
 0x40d   :  { %v973_v14 = vmul.f32 %v2317_v11, %v970_v5 }
 0x40f   :  { %v975_v38 = vmul.f32 %v973_v14, %v2933_v16  ;;  %v2975_v9 = vrot.slane %v973_v14, %v2675_v42 }
 0x411   :  { %v976_v39 = vsub.f32 %v974_v34, %v975_v38  ;;  %v983_v43 = vmul.f32 %v2975_v9, %v2885_v32  ;;  %v984_v15 = vmul.f32 %v2975_v9, %v2887_v30  ;;  %v985_v16 = vmul.f32 %v2975_v9, %v2889_v3 }
 0x412   :  { %v986_v21 = vmul.f32 %v2975_v9, %v2893_v33  ;;  %v987_v60 = vmul.f32 %v2975_v9, %v2896_v35  ;;  %v988_v61 = vmul.f32 %v2975_v9, %v2900_v41  ;;  %v989_v31 = vmul.f32 %v2975_v9, %v2902_v13 }
 0x413   :  { %v2978_v18 = vrot.slane %v976_v39, %v2675_v42  ;;  %v990_v8 = vmul.f32 %v2975_v9, %v2905_v53  ;;  %v991_v12 = vmul.f32 %v2975_v9, %v2908_v59  ;;  %v992_v46 = vmul.f32 %v2975_v9, %v2912_v52 }
 0x414   :  { %v993_v17 = vmul.f32 %v2975_v9, %v2914_v54  ;;  %v994_v20 = vmul.f32 %v2975_v9, %v2917_v56  ;;  %v996_v26 = vmul.f32 %v2975_v9, %v2924_v0  ;;  %v995_v27 = vmul.f32 %v2975_v9, %v2920_v1 }
 0x415   :  { %v1005_v44 = vadd.f32 %v2978_v18, %v983_v43  ;;  %v1006_v22 = vadd.f32 %v2978_v18, %v984_v15  ;;  %v1007_v55 = vadd.f32 %v2978_v18, %v985_v16  ;;  %v1008_v32 = vadd.f32 %v2978_v18, %v986_v21 }
 0x416   :  { %v1009_v62 = vadd.f32 %v2978_v18, %v987_v60  ;;  %v1010_v33 = vadd.f32 %v2978_v18, %v988_v61  ;;  %v1011_v37 = vadd.f32 %v2978_v18, %v989_v31  ;;  %v1012_v41 = vadd.f32 %v2978_v18, %v990_v8 }
 0x417   :  { %v1021_v48 = vmax.f32 %v1005_v44, 0.0  ;;  %v1022_v19 = vmax.f32 %v1006_v22, 0.0  ;;  %v1023_v30 = vmax.f32 %v1007_v55, 0.0  ;;  %v1024_v57 = vmax.f32 %v1008_v32, 0.0 }
 0x418   :  { %v1025_v36 = vmax.f32 %v1009_v62, 0.0  ;;  %v1026_v63 = vmax.f32 %v1010_v33, 0.0  ;;  %v1027_v7 = vmax.f32 %v1011_v37, 0.0  ;;  %v1028_v10 = vmax.f32 %v1012_v41, 0.0  ;;  %v2296_v33 = vld [vmem:[%s3494_s17 + $0x40] sm:$0xff]  }
 0x419   :  { %v1037_v51 = vpack.c.bf16 %v1022_v19, %v1021_v48  ;;  %v1038_v3 = vpack.c.bf16 %v1024_v57, %v1023_v30  ;;  %v1013_v47 = vadd.f32 %v2978_v18, %v991_v12  ;;  %v1014_v53 = vadd.f32 %v2978_v18, %v992_v46  ;;  %2070 = vmatprep.subr.bf16.mxu0 %v2296_v33  ;;  %v2299_v46 = vld [vmem:[%s3494_s17 + $0x8] sm:$0xff]  }
 0x41a   :  { %v1039_v35 = vpack.c.bf16 %v1026_v63, %v1025_v36  ;;  %v1040_v13 = vpack.c.bf16 %v1028_v10, %v1027_v7  ;;  %v1015_v23 = vadd.f32 %v2978_v18, %v993_v17  ;;  %v1016_v52 = vadd.f32 %v2978_v18, %v994_v20  ;;  %v2297_v63 = vld [vmem:[%s3494_s17] sm:$0xff]   ;;  %2230 = vmatprep.subr.bf16.mxu1 %v2296_v33  ;;  %v2298_v7 = vld [vmem:[%s3494_s17 + $0x48] sm:$0xff]   ;;  %v2300_v17 = vld [vmem:[%s3494_s17 + $0x50] sm:$0xff]  }
 0x41b   :  { %1186 = vmatmul.mubr.bf16.vlgmr.msra.gmra.mrb[16].mxu1 %v1037_v51  ;;  %v1029_v49 = vmax.f32 %v1013_v47, 0.0  ;;  %v1030_v58 = vmax.f32 %v1014_v53, 0.0  ;;  %v1017_v6 = vadd.f32 %v2978_v18, %v995_v27  ;;  %v1018_v56 = vadd.f32 %v2978_v18, %v996_v26  ;;  %2071 = vmatpush3.bf16.msra.mxu0 %v2297_v63 }
 0x41c   :  { %1195 = vmatprep.mubr.bf16.mxu1 %v2386_v24  ;;  %v1031_v50 = vmax.f32 %v1015_v23, 0.0  ;;  %v1032_v25 = vmax.f32 %v1016_v52, 0.0  ;;  %v997_v29 = vmul.f32 %v2975_v9, %v2926_v4  ;;  %v998_v5 = vmul.f32 %v2975_v9, %v2929_v45  ;;  %v1061_v9 = vld [vmem:[%s3493_s14] sm:$0x3]  ;;  %2238 = vmatpush3.bf16.msra.mxu1 %v2297_v63  ;;  %v2301_v23 = vld [vmem:[%s3494_s17 + $0x10] sm:$0xff]  }
 0x41d   :  { %v1041_v59 = vpack.c.bf16 %v1030_v58, %v1029_v49  ;;  %v1033_v2 = vmax.f32 %v1017_v6, 0.0  ;;  %v1034_v28 = vmax.f32 %v1018_v56, 0.0  ;;  %2072 = vmatprep.subr.bf16.mxu0 %v2298_v7  ;;  %2231 = vmatprep.subr.bf16.mxu1 %v2298_v7 }
 0x41e   :  { %v1042_v54 = vpack.c.bf16 %v1032_v25, %v1031_v50  ;;  %v1019_v11 = vadd.f32 %v2978_v18, %v997_v29  ;;  %v1020_v1 = vadd.f32 %v2978_v18, %v998_v5  ;;  %v3039_v18 = vsub.s32 1, %v2669_v40 }
 0x41f   :  { %v1043_v0 = vpack.c.bf16 %v1034_v28, %v1033_v2  ;;  %2073 = vmatpush3.bf16.msra.mxu0 %v2299_v46  ;;  %v2303_v2 = vld [vmem:[%s3494_s17 + $0x18] sm:$0xff]  }
 0x420   :  { %v1035_v14 = vmax.f32 %v1019_v11, 0.0  ;;  %v1036_v34 = vmax.f32 %v1020_v1, 0.0  ;;  %v3045_v19 = vrot.slane %v1061_v9, %v3039_v18  ;;  %2239 = vmatpush3.bf16.msra.mxu1 %v2299_v46  ;;  %2074 = vmatprep.subr.bf16.mxu0 %v2300_v17 }
 0x421   :  { %2232 = vmatprep.subr.bf16.mxu1 %v2300_v17 }
 0x422   :  { %v1044_v38 = vpack.c.bf16 %v1036_v34, %v1035_v14  ;;  %v2304_v34 = vld [vmem:[%s3494_s17 + $0x60] sm:$0xff]  }
 0x423   :  { %1196 = vmatmul.mubr.bf16.gmra.mrb[20].mxu1 %v1038_v3  ;;  %2075 = vmatpush3.bf16.msra.mxu0 %v2301_v23 }
 0x424   :  { %1205 = vmatprep.mubr.bf16.mxu1 %v2386_v24  ;;  %2240 = vmatpush3.bf16.msra.mxu1 %v2301_v23 }
 0x42b   :  { %1206 = vmatmul.mubr.bf16.gmra.mrb[24].mxu1 %v1039_v35 }
 0x42c   :  { %1215 = vmatprep.mubr.bf16.mxu1 %v2386_v24 }
 0x433   :  { %1216 = vmatmul.mubr.bf16.gmra.mrb[28].mxu1 %v1040_v13 }
 0x434   :  { %1225 = vmatprep.mubr.bf16.mxu1 %v2386_v24 }
 0x43b   :  { %1226 = vmatmul.mubr.bf16.gmra.mrb[32].mxu1 %v1041_v59 }
 0x43c   :  { %1235 = vmatprep.mubr.bf16.mxu1 %v2386_v24 }
 0x443   :  { %1236 = vmatmul.mubr.bf16.gmra.mrb[36].mxu1 %v1042_v54  ;;  %v2302_v54 = vld [vmem:[%s3494_s17 + $0x58] sm:$0xff]  }
 0x444   :  { %1245 = vmatprep.mubr.bf16.mxu1 %v2386_v24  ;;  %2076 = vmatprep.subr.bf16.mxu0 %v2302_v54 }
 0x445   :  { %2233 = vmatprep.subr.bf16.mxu1 %v2302_v54  ;;  %2077 = vmatpush3.bf16.msra.mxu0 %v2303_v2 }
 0x446   :  { %2241 = vmatpush3.bf16.msra.mxu1 %v2303_v2  ;;  %2078 = vmatprep.subr.bf16.mxu0 %v2304_v34 }
 0x447   :  { %2234 = vmatprep.subr.bf16.mxu1 %v2304_v34 }
 0x44b   :  { %1246 = vmatmul.mubr.bf16.gmra.mrb[40].mxu1 %v1043_v0 }
 0x44c   :  { %1255 = vmatprep.mubr.bf16.mxu1 %v2386_v24  ;;  %v3042_v24 = vrot.slane %v1061_v9, %v2675_v42 }
 0x453   :  { %1256 = vmatmul.mubr.bf16.gmra.mrb[44].mxu1 %v1044_v38 }
 0x4ee   :  { %v1187_v39 = vpop.f32.mrb[16].mxu1 }
 0x4ef   :  { %v1189_v43 = vpop.f32.mrb[17].mxu1  ;;  %v3054_v30 = vadd.f32 %v1187_v39, %v3042_v24  ;;  %v2305_v39 = vld [vmem:[%s3494_s17 + $0x20] sm:$0xff]  }
 0x4f0   :  { %v1191_v15 = vpop.f32.mrb[18].mxu1  ;;  %v3060_v61 = vadd.f32 %v1189_v43, %v3045_v19  ;;  %2079 = vmatpush3.bf16.msra.mxu0 %v2305_v39  ;;  %2242 = vmatpush3.bf16.msra.mxu1 %v2305_v39 }
 0x4f1   :  { %v1193_v44 = vpop.f32.mrb[19].mxu1  ;;  %v3048_v21 = vadd.f32 %v1191_v15, %v3042_v24 }
 0x4f2   :  { %v3051_v55 = vadd.f32 %v1193_v44, %v3045_v19 }
 0x4f3   :  { %v1266_v62 = vadd.f32 %v3048_v21, %v3054_v30 }
 0x4f4   :  { %v1287_v36 = vadd.f32 %v3051_v55, %v3060_v61 }
 0x4f6   :  { %v1197_v4 = vpop.f32.mrb[20].mxu1 }
 0x4f7   :  { %v1199_v22 = vpop.f32.mrb[21].mxu1  ;;  %v3057_v57 = vadd.f32 %v1197_v4, %v3042_v24 }
 0x4f8   :  { %v1201_v48 = vpop.f32.mrb[22].mxu1  ;;  %v3063_v3 = vadd.f32 %v1199_v22, %v3045_v19  ;;  %v2306_v22 = vld [vmem:[%s3494_s17 + $0x68] sm:$0xff]  }
 0x4f9   :  { %v1203_v45 = vpop.f32.mrb[23].mxu1  ;;  %v1267_v31 = vadd.f32 %v1266_v62, %v3057_v57  ;;  %v3077_v8 = vadd.f32 %v1201_v48, %v3042_v24  ;;  %2080 = vmatprep.subr.bf16.mxu0 %v2306_v22  ;;  %2235 = vmatprep.subr.bf16.mxu1 %v2306_v22 }
 0x4fa   :  { %v1288_v35 = vadd.f32 %v1287_v36, %v3063_v3  ;;  %v3081_v37 = vadd.f32 %v1203_v45, %v3045_v19  ;;  %v2308_v36 = vld [vmem:[%s3494_s17 + $0x70] sm:$0xff]  }
 0x4fb   :  { %v1268_v53 = vadd.f32 %v1267_v31, %v3077_v8  ;;  %v2309_v31 = vld [vmem:[%s3494_s17 + $0x30] sm:$0xff]  }
 0x4fc   :  { %v1289_v58 = vadd.f32 %v1288_v35, %v3081_v37 }
 0x4fe   :  { %v1207_v16 = vpop.f32.mrb[24].mxu1 }
 0x4ff   :  { %v1209_v51 = vpop.f32.mrb[25].mxu1  ;;  %v3087_v10 = vadd.f32 %v1207_v16, %v3042_v24  ;;  %v2307_v16 = vld [vmem:[%s3494_s17 + $0x28] sm:$0xff]  }
 0x500   :  { %v1211_v32 = vpop.f32.mrb[26].mxu1  ;;  %v3093_v13 = vadd.f32 %v1209_v51, %v3045_v19  ;;  %2081 = vmatpush3.bf16.msra.mxu0 %v2307_v16  ;;  %2243 = vmatpush3.bf16.msra.mxu1 %v2307_v16 }
 0x501   :  { %v1213_v60 = vpop.f32.mrb[27].mxu1  ;;  %v1269_v20 = vadd.f32 %v1268_v53, %v3087_v10  ;;  %v3102_v59 = vadd.f32 %v1211_v32, %v3042_v24  ;;  %2082 = vmatprep.subr.bf16.mxu0 %v2308_v36  ;;  %2236 = vmatprep.subr.bf16.mxu1 %v2308_v36 }
 0x502   :  { %v1290_v52 = vadd.f32 %v1289_v58, %v3093_v13  ;;  %v3109_v50 = vadd.f32 %v1213_v60, %v3045_v19  ;;  %v2311_v58 = vld [vmem:[%s3494_s17 + $0x38] sm:$0xff]  }
 0x503   :  { %v1270_v6 = vadd.f32 %v1269_v20, %v3102_v59 }
 0x504   :  { %v1291_v28 = vadd.f32 %v1290_v52, %v3109_v50  ;;  %2083 = vmatpush3.bf16.msra.mxu0 %v2309_v31  ;;  %2244 = vmatpush3.bf16.msra.mxu1 %v2309_v31 }
 0x506   :  { %v1217_v41 = vpop.f32.mrb[28].mxu1 }
 0x507   :  { %v1219_v12 = vpop.f32.mrb[29].mxu1  ;;  %v3112_v25 = vadd.f32 %v1217_v41, %v3042_v24  ;;  %v2310_v41 = vld [vmem:[%s3494_s17 + $0x78] sm:$0xff]  }
 0x508   :  { %v1221_v47 = vpop.f32.mrb[30].mxu1  ;;  %v3115_v26 = vadd.f32 %v1219_v12, %v3045_v19  ;;  %2084 = vmatprep.subr.bf16.mxu0 %v2310_v41  ;;  %2237 = vmatprep.subr.bf16.mxu1 %v2310_v41 }
 0x509   :  { %v1223_v49 = vpop.f32.mrb[31].mxu1  ;;  %v1271_v5 = vadd.f32 %v1270_v6, %v3112_v25  ;;  %v3127_v0 = vadd.f32 %v1221_v47, %v3042_v24  ;;  %2085 = vmatpush3.bf16.msra.mxu0 %v2311_v58  ;;  %2245 = vmatpush3.bf16.msra.mxu1 %v2311_v58 }
 0x50a   :  { %v1292_v1 = vadd.f32 %v1291_v28, %v3115_v26  ;;  %v3131_v14 = vadd.f32 %v1223_v49, %v3045_v19 }
 0x50b   :  { %v1272_v15 = vadd.f32 %v1271_v5, %v3127_v0 }
 0x50c   :  { %v1293_v44 = vadd.f32 %v1292_v1, %v3131_v14 }
 0x50e   :  { %v1227_v27 = vpop.f32.mrb[32].mxu1 }
 0x50f   :  { %v1229_v56 = vpop.f32.mrb[33].mxu1  ;;  %v3137_v38 = vadd.f32 %v1227_v27, %v3042_v24 }
 0x510   :  { %v1231_v29 = vpop.f32.mrb[34].mxu1  ;;  %v3143_v43 = vadd.f32 %v1229_v56, %v3045_v19 }
 0x511   :  { %v1233_v11 = vpop.f32.mrb[35].mxu1  ;;  %v1273_v48 = vadd.f32 %v1272_v15, %v3137_v38  ;;  %v3152_v45 = vadd.f32 %v1231_v29, %v3042_v24 }
 0x512   :  { %v1294_v51 = vadd.f32 %v1293_v44, %v3143_v43  ;;  %v3159_v32 = vadd.f32 %v1233_v11, %v3045_v19 }
 0x513   :  { %v1274_v35 = vadd.f32 %v1273_v48, %v3152_v45 }
 0x514   :  { %v1295_v7 = vadd.f32 %v1294_v51, %v3159_v32 }
 0x516   :  { %v1237_v4 = vpop.f32.mrb[36].mxu1 }
 0x517   :  { %v1239_v9 = vpop.f32.mrb[37].mxu1  ;;  %v3162_v62 = vadd.f32 %v1237_v4, %v3042_v24 }
 0x518   :  { %v1241_v60 = vpop.f32.mrb[38].mxu1  ;;  %v3168_v63 = vadd.f32 %v1239_v9, %v3045_v19 }
 0x519   :  { %v1243_v33 = vpop.f32.mrb[39].mxu1  ;;  %v1275_v12 = vadd.f32 %v1274_v35, %v3162_v62  ;;  %v3180_v46 = vadd.f32 %v1241_v60, %v3042_v24 }
 0x51a   :  { %v1296_v47 = vadd.f32 %v1295_v7, %v3168_v63  ;;  %v3184_v53 = vadd.f32 %v1243_v33, %v3045_v19 }
 0x51b   :  { %v1276_v27 = vadd.f32 %v1275_v12, %v3180_v46 }
 0x51c   :  { %v1297_v6 = vadd.f32 %v1296_v47, %v3184_v53 }
 0x51e   :  { %v1247_v49 = vpop.f32.mrb[40].mxu1 }
 0x51f   :  { %v3190_v17 = vadd.f32 %v1247_v49, %v3042_v24  ;;  %v1249_v20 = vpop.f32.mrb[41].mxu1 }
 0x520   :  { %v3193_v23 = vadd.f32 %v1249_v20, %v3045_v19  ;;  %v1251_v52 = vpop.f32.mrb[42].mxu1 }
 0x521   :  { %v1253_v54 = vpop.f32.mrb[43].mxu1  ;;  %v1277_v56 = vadd.f32 %v1276_v27, %v3190_v17  ;;  %v3199_v2 = vadd.f32 %v1251_v52, %v3042_v24 }
 0x522   :  { %v1298_v28 = vadd.f32 %v1297_v6, %v3193_v23  ;;  %v3203_v29 = vadd.f32 %v1253_v54, %v3045_v19 }
 0x523   :  { %v1278_v11 = vadd.f32 %v1277_v56, %v3199_v2 }
 0x524   :  { %v1299_v39 = vadd.f32 %v1298_v28, %v3203_v29 }
 0x526   :  { %v1257_v5 = vpop.f32.mrb[44].mxu1 }
 0x527   :  { %v3207_v1 = vadd.f32 %v1257_v5, %v3042_v24  ;;  %v1259_v34 = vpop.f32.mrb[45].mxu1 }
 0x528   :  { %v3211_v15 = vadd.f32 %v1259_v34, %v3045_v19  ;;  %v1261_v44 = vpop.f32.mrb[46].mxu1 }
 0x529   :  { %v1279_v4 = vadd.f32 %v1278_v11, %v3207_v1  ;;  %v3215_v22 = vadd.f32 %v1261_v44, %v3042_v24  ;;  %v1263_v48 = vpop.f32.mrb[47].mxu1 }
 0x52a   :  { %v1300_v9 = vadd.f32 %v1299_v39, %v3211_v15  ;;  %v3219_v16 = vadd.f32 %v1263_v48, %v3045_v19 }
 0x52b   :  { %v1280_v51 = vadd.f32 %v1279_v4, %v3215_v22 }
 0x52c   :  { %v1301_v60 = vadd.f32 %v1300_v9, %v3219_v16 }
 0x52d   :  { %v1281_v33 = vrot.slane %v1280_v51, 4 }
 0x52e   :  { %v1302_v36 = vrot.slane %v1301_v60, 4 }
 0x52f   :  { %v1282_v31 = vadd.f32 %v1281_v33, %v1280_v51 }
 0x530   :  { %v1303_v35 = vadd.f32 %v1302_v36, %v1301_v60 }
 0x531   :  { %v1283_v41 = vrot.slane %v1282_v31, 2 }
 0x532   :  { %v1304_v7 = vrot.slane %v1303_v35, 2 }
 0x533   :  { %v1284_v12 = vadd.f32 %v1283_v41, %v1282_v31 }
 0x534   :  { %v1305_v47 = vadd.f32 %v1304_v7, %v1303_v35 }
 0x535   :  { %v1285_v24 = vrot.slane %v1284_v12, 1 }
 0x536   :  { %v1306_v58 = vrot.slane %v1305_v47, 1 }
 0x537   :  { %v1286_v49 = vadd.f32 %v1285_v24, %v1284_v12 }
 0x538   :  { %v1307_v27 = vadd.f32 %v1306_v58, %v1305_v47 }
 0x539   :  { %v3223_v20 = vmul.f32 0.0078125, %v1286_v49 }
 0x53a   :  { %v3231_v28 = vmul.f32 0.0078125, %v1307_v27 }
 0x53b   :  { %v1310_v19 = vsub.f32 %v3054_v30, %v3223_v20  ;;  %v1312_v52 = vsub.f32 %v3048_v21, %v3223_v20  ;;  %v1314_v54 = vsub.f32 %v3057_v57, %v3223_v20  ;;  %v1316_v5 = vsub.f32 %v3077_v8, %v3223_v20 }
 0x53c   :  { %v1318_v11 = vsub.f32 %v3087_v10, %v3223_v20  ;;  %v1311_v44 = vsub.f32 %v3060_v61, %v3231_v28  ;;  %v1313_v4 = vsub.f32 %v3051_v55, %v3231_v28  ;;  %v1320_v48 = vsub.f32 %v3102_v59, %v3223_v20 }
 0x53d   :  { %v1342_v6 = vmul.f32 %v1310_v19, %v1310_v19  ;;  %v1344_v56 = vmul.f32 %v1312_v52, %v1312_v52  ;;  %v1346_v34 = vmul.f32 %v1314_v54, %v1314_v54  ;;  %v1348_v9 = vmul.f32 %v1316_v5, %v1316_v5 }
 0x53e   :  { %v1322_v60 = vsub.f32 %v3112_v25, %v3223_v20  ;;  %v1350_v33 = vmul.f32 %v1318_v11, %v1318_v11  ;;  %v1315_v31 = vsub.f32 %v3063_v3, %v3231_v28  ;;  %v1343_v35 = vmul.f32 %v1311_v44, %v1311_v44 }
 0x53f   :  { %v1374_v39 = vadd.f32 %v1344_v56, %v1342_v6  ;;  %v1345_v41 = vmul.f32 %v1313_v4, %v1313_v4  ;;  %v1324_v7 = vsub.f32 %v3127_v0, %v3223_v20  ;;  %v1352_v12 = vmul.f32 %v1320_v48, %v1320_v48 }
 0x540   :  { %v1317_v24 = vsub.f32 %v3081_v37, %v3231_v28  ;;  %v1326_v49 = vsub.f32 %v3137_v38, %v3223_v20  ;;  %v1354_v58 = vmul.f32 %v1322_v60, %v1322_v60  ;;  %v1319_v52 = vsub.f32 %v3093_v13, %v3231_v28 }
 0x541   :  { %v1375_v51 = vadd.f32 %v1374_v39, %v1346_v34  ;;  %v1347_v27 = vmul.f32 %v1315_v31, %v1315_v31  ;;  %v1395_v54 = vadd.f32 %v1345_v41, %v1343_v35  ;;  %v1328_v6 = vsub.f32 %v3152_v45, %v3223_v20 }
 0x542   :  { %v1356_v56 = vmul.f32 %v1324_v7, %v1324_v7  ;;  %v1321_v11 = vsub.f32 %v3109_v50, %v3231_v28  ;;  %v1349_v34 = vmul.f32 %v1317_v24, %v1317_v24  ;;  %v1330_v44 = vsub.f32 %v3162_v62, %v3223_v20 }
 0x543   :  { %v1376_v36 = vadd.f32 %v1375_v51, %v1348_v9  ;;  %v1396_v39 = vadd.f32 %v1395_v54, %v1347_v27  ;;  %v1358_v4 = vmul.f32 %v1326_v49, %v1326_v49  ;;  %v1323_v9 = vsub.f32 %v3115_v26, %v3231_v28 }
 0x544   :  { %v1351_v51 = vmul.f32 %v1319_v52, %v1319_v52  ;;  %v1325_v35 = vsub.f32 %v3131_v14, %v3231_v28  ;;  %v1353_v41 = vmul.f32 %v1321_v11, %v1321_v11  ;;  %v1327_v49 = vsub.f32 %v3143_v43, %v3231_v28 }
 0x545   :  { %v1377_v47 = vadd.f32 %v1376_v36, %v1350_v33  ;;  %v1397_v60 = vadd.f32 %v1396_v39, %v1349_v34  ;;  %v1332_v33 = vsub.f32 %v3180_v46, %v3223_v20  ;;  %v1360_v36 = vmul.f32 %v1328_v6, %v1328_v6 }
 0x546   :  { %v1336_v52 = vsub.f32 %v3199_v2, %v3223_v20  ;;  %v1329_v6 = vsub.f32 %v3159_v32, %v3231_v28  ;;  %v1338_v11 = vsub.f32 %v3207_v1, %v3223_v20 }
 0x547   :  { %v1378_v19 = vadd.f32 %v1377_v47, %v1352_v12  ;;  %v1398_v7 = vadd.f32 %v1397_v60, %v1351_v51  ;;  %v1334_v12 = vsub.f32 %v3190_v17, %v3223_v20  ;;  %v1362_v47 = vmul.f32 %v1330_v44, %v1330_v44 }
 0x548   :  { %v1364_v27 = vmul.f32 %v1332_v33, %v1332_v33  ;;  %v1331_v44 = vsub.f32 %v3168_v63, %v3231_v28  ;;  %v1368_v51 = vmul.f32 %v1336_v52, %v1336_v52  ;;  %v1333_v33 = vsub.f32 %v3184_v53, %v3231_v28 }
 0x549   :  { %v1379_v5 = vadd.f32 %v1378_v19, %v1354_v58  ;;  %v1355_v58 = vmul.f32 %v1323_v9, %v1323_v9  ;;  %v1399_v19 = vadd.f32 %v1398_v7, %v1353_v41  ;;  %v1366_v34 = vmul.f32 %v1334_v12, %v1334_v12 }
 0x54a   :  { %v1340_v9 = vsub.f32 %v3215_v22, %v3223_v20  ;;  %v1335_v7 = vsub.f32 %v3193_v23, %v3231_v28  ;;  %v1363_v12 = vmul.f32 %v1331_v44, %v1331_v44 }
 0x54b   :  { %v1380_v48 = vadd.f32 %v1379_v5, %v1356_v56  ;;  %v1357_v56 = vmul.f32 %v1325_v35, %v1325_v35  ;;  %v1400_v5 = vadd.f32 %v1399_v19, %v1355_v58  ;;  %v1370_v35 = vmul.f32 %v1338_v11, %v1338_v11 }
 0x54c   :  { %v1337_v58 = vsub.f32 %v3203_v29, %v3231_v28  ;;  %v1365_v19 = vmul.f32 %v1333_v33, %v1333_v33  ;;  %v1341_v11 = vsub.f32 %v3219_v16, %v3231_v28 }
 0x54d   :  { %v1381_v31 = vadd.f32 %v1380_v48, %v1358_v4  ;;  %v1359_v4 = vmul.f32 %v1327_v49, %v1327_v49  ;;  %v1401_v48 = vadd.f32 %v1400_v5, %v1357_v56 }
 0x54f   :  { %v1382_v24 = vadd.f32 %v1381_v31, %v1360_v36  ;;  %v1361_v36 = vmul.f32 %v1329_v6, %v1329_v6  ;;  %v1402_v31 = vadd.f32 %v1401_v48, %v1359_v4  ;;  %v1367_v6 = vmul.f32 %v1335_v7, %v1335_v7 }
 0x551   :  { %v1383_v54 = vadd.f32 %v1382_v24, %v1362_v47  ;;  %v1403_v47 = vadd.f32 %v1402_v31, %v1361_v36  ;;  %v1372_v24 = vmul.f32 %v1340_v9, %v1340_v9 }
 0x553   :  { %v1384_v39 = vadd.f32 %v1383_v54, %v1364_v27  ;;  %v1404_v52 = vadd.f32 %v1403_v47, %v1363_v12  ;;  %v1339_v54 = vsub.f32 %v3211_v15, %v3231_v28 }
 0x555   :  { %v1385_v60 = vadd.f32 %v1384_v39, %v1366_v34  ;;  %v1405_v56 = vadd.f32 %v1404_v52, %v1365_v19  ;;  %v1369_v34 = vmul.f32 %v1337_v58, %v1337_v58  ;;  %v1371_v4 = vmul.f32 %v1339_v54, %v1339_v54 }
 0x556   :  { %v2387_v54 = vmov 1966171168  }
 0x557   :  { %v1386_v41 = vadd.f32 %v1385_v60, %v1368_v51  ;;  %v1406_v39 = vadd.f32 %v1405_v56, %v1367_v6  ;;  %v1373_v51 = vmul.f32 %v1341_v11, %v1341_v11  ;;  %v1427_v6 = vunpack.c.l.s4 %v2387_v54 }
 0x559   :  { %v1387_v49 = vadd.f32 %v1386_v41, %v1370_v35  ;;  %v1407_v48 = vadd.f32 %v1406_v39, %v1369_v34  ;;  %v1428_v56 = vunpack.c.0.s8 %v1427_v6 }
 0x55b   :  { %v1388_v27 = vadd.f32 %v1387_v49, %v1372_v24  ;;  %v1408_v60 = vadd.f32 %v1407_v48, %v1371_v4  ;;  %v1431_v11 = vsub.s32 %v1428_v56, %v2669_v40  ;;  %v1418_v4 = vld [vmem:[%s3495_s15] sm:$0x3] }
 0x55d   :  { %v1389_v5 = vrot.slane %v1388_v27, 4  ;;  %v1409_v36 = vadd.f32 %v1408_v60, %v1373_v51 }
 0x55f   :  { %v1390_v44 = vadd.f32 %v1389_v5, %v1388_v27  ;;  %v1410_v35 = vrot.slane %v1409_v36, 4 }
 0x561   :  { %v1391_v9 = vrot.slane %v1390_v44, 2  ;;  %v1411_v12 = vadd.f32 %v1410_v35, %v1409_v36  ;;  %v1442_v35 = vld [vmem:[%s3496_s16] sm:$0x3] }
 0x563   :  { %v1392_v33 = vadd.f32 %v1391_v9, %v1390_v44  ;;  %v1412_v7 = vrot.slane %v1411_v12, 2 }
 0x565   :  { %v1393_v31 = vrot.slane %v1392_v33, 1  ;;  %v1413_v24 = vadd.f32 %v1412_v7, %v1411_v12 }
 0x567   :  { %v1394_v41 = vadd.f32 %v1393_v31, %v1392_v33  ;;  %v1414_v49 = vrot.slane %v1413_v24, 1 }
 0x569   :  { %v1416_v47 = vmul.f32 0.0078125, %v1394_v41  ;;  %v1415_v52 = vadd.f32 %v1414_v49, %v1413_v24 }
 0x56b   :  { %v1419_v19 = vadd.f32 1e-05, %v1416_v47  ;;  %v1417_v58 = vmul.f32 0.0078125, %v1415_v52 }
 0x56d   :  { %2318 = vrsqrt.f32 %v1419_v19  ;;  %v1420_v27 = vadd.f32 1e-05, %v1417_v58 }
 0x56f   :  { %2320 = vrsqrt.f32 %v1420_v27 }
 0x577   :  { %v2319_v5 = vpop.eup %2318 }
 0x579   :  { %v2321_v34 = vpop.eup %2320 }
 0x57a   :  { %v1425_v39 = vcombine.low %v2319_v5, %v2321_v34 }
 0x57c   :  { %v1432_v44 = vrot.slane %v1425_v39, %v1431_v11 }
 0x57e   :  { %v1439_v48 = vrot.slane %v1432_v44, %v1431_v11 }
 0x580   :  { %v1441_v9 = vmul.f32 %v1439_v48, %v1418_v4 }
 0x582   :  { %v3296_v51 = vrot.slane %v1441_v9, %v2675_v42  ;;  %v3299_v60 = vrot.slane %v1441_v9, %v3039_v18 }
 0x584   :  { %v1454_v33 = vmul.f32 %v3296_v51, %v3223_v20  ;;  %v1455_v40 = vmul.f32 %v3299_v60, %v3231_v28  ;;  %v1506_v12 = vmul.f32 %v3299_v60, %v3219_v16  ;;  %v1476_v7 = vmul.f32 %v3299_v60, %v3060_v61 }
 0x585   :  { %v1478_v47 = vmul.f32 %v3299_v60, %v3051_v55  ;;  %v1500_v20 = vmul.f32 %v3299_v60, %v3193_v23  ;;  %v1502_v28 = vmul.f32 %v3299_v60, %v3203_v29  ;;  %v1475_v49 = vmul.f32 %v3296_v51, %v3054_v30 }
 0x586   :  { %v1458_v36 = vcombine.low %v1454_v33, %v1455_v40  ;;  %v1477_v19 = vmul.f32 %v3296_v51, %v3048_v21  ;;  %v1499_v16 = vmul.f32 %v3296_v51, %v3190_v17  ;;  %v1501_v61 = vmul.f32 %v3296_v51, %v3199_v2 }
 0x587   :  { %v1480_v55 = vmul.f32 %v3299_v60, %v3063_v3  ;;  %v1482_v23 = vmul.f32 %v3299_v60, %v3081_v37  ;;  %v1504_v29 = vmul.f32 %v3299_v60, %v3211_v15  ;;  %v1479_v17 = vmul.f32 %v3296_v51, %v3057_v57 }
 0x588   :  { %v1465_v31 = vrot.slane %v1458_v36, %v1431_v11  ;;  %v1481_v2 = vmul.f32 %v3296_v51, %v3077_v8  ;;  %v1503_v3 = vmul.f32 %v3296_v51, %v3207_v1  ;;  %v1505_v37 = vmul.f32 %v3296_v51, %v3215_v22 }
 0x589   :  { %v1484_v15 = vmul.f32 %v3299_v60, %v3093_v13 }
 0x58a   :  { %v1472_v41 = vrot.slane %v1465_v31, %v1431_v11 }
 0x58c   :  { %v1474_v24 = vsub.f32 %v1442_v35, %v1472_v41 }
 0x58e   :  { %v3333_v30 = vrot.slane %v1474_v24, %v2675_v42  ;;  %v3336_v21 = vrot.slane %v1474_v24, %v3039_v18  ;;  %v1486_v42 = vmul.f32 %v3299_v60, %v3109_v50 }
 0x590   :  { %v1519_v18 = vadd.f32 %v3336_v21, %v1476_v7  ;;  %v1521_v52 = vadd.f32 %v3336_v21, %v1478_v47  ;;  %v1543_v57 = vadd.f32 %v3336_v21, %v1500_v20  ;;  %v1545_v8 = vadd.f32 %v3336_v21, %v1502_v28 }
 0x591   :  { %v1518_v58 = vadd.f32 %v3333_v30, %v1475_v49  ;;  %v1520_v1 = vadd.f32 %v3333_v30, %v1477_v19  ;;  %v1542_v22 = vadd.f32 %v3333_v30, %v1499_v16  ;;  %v1544_v27 = vadd.f32 %v3333_v30, %v1501_v61 }
 0x592   :  { %v1551_v13 = vmax.f32 %v1519_v18, 0.0  ;;  %v1553_v54 = vmax.f32 %v1521_v52, 0.0  ;;  %v1575_v6 = vmax.f32 %v1543_v57, 0.0  ;;  %v1577_v50 = vmax.f32 %v1545_v8, 0.0 }
 0x593   :  { %v1550_v56 = vmax.f32 %v1518_v58, 0.0  ;;  %v1552_v5 = vmax.f32 %v1520_v1, 0.0  ;;  %v1574_v11 = vmax.f32 %v1542_v22, 0.0  ;;  %v1576_v34 = vmax.f32 %v1544_v27, 0.0 }
 0x594   :  { %v1583_v39 = vpack.c.bf16 %v1553_v54, %v1551_v13  ;;  %v1595_v44 = vpack.c.bf16 %v1577_v50, %v1575_v6  ;;  %v1523_v4 = vadd.f32 %v3336_v21, %v1480_v55  ;;  %v1525_v48 = vadd.f32 %v3336_v21, %v1482_v23 }
 0x595   :  { %v1582_v9 = vpack.c.bf16 %v1552_v5, %v1550_v56  ;;  %v1594_v33 = vpack.c.bf16 %v1576_v34, %v1574_v11  ;;  %v1547_v40 = vadd.f32 %v3336_v21, %v1504_v29  ;;  %v1549_v36 = vadd.f32 %v3336_v21, %v1506_v12 }
 0x596   :  { %1765 = vmatprep.mubr.bf16.mxu0 %v1583_v39  ;;  %1813 = vmatprep.mubr.bf16.mxu1 %v1595_v44  ;;  %v1555_v31 = vmax.f32 %v1523_v4, 0.0  ;;  %v1557_v35 = vmax.f32 %v1525_v48, 0.0  ;;  %v1522_v41 = vadd.f32 %v3333_v30, %v1479_v17  ;;  %v1524_v7 = vadd.f32 %v3333_v30, %v1481_v2 }
 0x597   :  { %1766 = vmatmul.mubr.bf16.vlgmr.msra.gmra.mrb[32].mxu0 %v1582_v9  ;;  %1814 = vmatmul.mubr.bf16.vlgmr.msra.gmra.mrb[48].mxu1 %v1594_v33  ;;  %v1579_v47 = vmax.f32 %v1547_v40, 0.0  ;;  %v1581_v20 = vmax.f32 %v1549_v36, 0.0  ;;  %v1546_v28 = vadd.f32 %v3333_v30, %v1503_v3  ;;  %v1548_v24 = vadd.f32 %v3333_v30, %v1505_v37 }
 0x598   :  { %v1585_v49 = vpack.c.bf16 %v1557_v35, %v1555_v31  ;;  %v1554_v19 = vmax.f32 %v1522_v41, 0.0  ;;  %v1556_v16 = vmax.f32 %v1524_v7, 0.0  ;;  %v1527_v12 = vadd.f32 %v3336_v21, %v1484_v15 }
 0x599   :  { %v1597_v61 = vpack.c.bf16 %v1581_v20, %v1579_v47  ;;  %v1578_v55 = vmax.f32 %v1546_v28, 0.0  ;;  %v1580_v23 = vmax.f32 %v1548_v24, 0.0  ;;  %v1529_v29 = vadd.f32 %v3336_v21, %v1486_v42 }
 0x59a   :  { %1773 = vmatprep.mubr.bf16.mxu0 %v1585_v49  ;;  %v1559_v17 = vmax.f32 %v1527_v12, 0.0  ;;  %v1483_v18 = vmul.f32 %v3296_v51, %v3087_v10  ;;  %v1485_v3 = vmul.f32 %v3296_v51, %v3102_v59  ;;  %v1488_v37 = vmul.f32 %v3299_v60, %v3115_v26 }
 0x59b   :  { %1821 = vmatprep.mubr.bf16.mxu1 %v1597_v61  ;;  %v1561_v2 = vmax.f32 %v1529_v29, 0.0  ;;  %v1490_v15 = vmul.f32 %v3299_v60, %v3131_v14  ;;  %v1584_v52 = vpack.c.bf16 %v1556_v16, %v1554_v19  ;;  %v1596_v57 = vpack.c.bf16 %v1580_v23, %v1578_v55 }
 0x59c   :  { %v1526_v42 = vadd.f32 %v3333_v30, %v1483_v18  ;;  %v1528_v8 = vadd.f32 %v3333_v30, %v1485_v3  ;;  %v1531_v1 = vadd.f32 %v3336_v21, %v1488_v37  ;;  %v1487_v14 = vmul.f32 %v3296_v51, %v3112_v25 }
 0x59d   :  { %v1587_v58 = vpack.c.bf16 %v1561_v2, %v1559_v17  ;;  %v1533_v10 = vadd.f32 %v3336_v21, %v1490_v15  ;;  %v1489_v13 = vmul.f32 %v3296_v51, %v3127_v0  ;;  %v1492_v54 = vmul.f32 %v3299_v60, %v3143_v43 }
 0x59e   :  { %v1558_v59 = vmax.f32 %v1526_v42, 0.0  ;;  %v1560_v22 = vmax.f32 %v1528_v8, 0.0  ;;  %v1563_v26 = vmax.f32 %v1531_v1, 0.0  ;;  %v1494_v6 = vmul.f32 %v3299_v60, %v3159_v32 }
 0x59f   :  { %1774 = vmatmul.mubr.bf16.gmra.mrb[36].mxu0 %v1584_v52  ;;  %1822 = vmatmul.mubr.bf16.gmra.mrb[52].mxu1 %v1596_v57  ;;  %v1565_v27 = vmax.f32 %v1533_v10, 0.0  ;;  %v1530_v56 = vadd.f32 %v3333_v30, %v1487_v14  ;;  %v1532_v5 = vadd.f32 %v3333_v30, %v1489_v13  ;;  %v1535_v34 = vadd.f32 %v3336_v21, %v1492_v54 }
 0x5a0   :  { %1781 = vmatprep.mubr.bf16.mxu0 %v1587_v58  ;;  %v1586_v50 = vpack.c.bf16 %v1560_v22, %v1558_v59  ;;  %v1537_v39 = vadd.f32 %v3336_v21, %v1494_v6  ;;  %v1491_v43 = vmul.f32 %v3296_v51, %v3137_v38  ;;  %v1493_v32 = vmul.f32 %v3296_v51, %v3152_v45 }
 0x5a1   :  { %v1589_v11 = vpack.c.bf16 %v1565_v27, %v1563_v26  ;;  %v1562_v25 = vmax.f32 %v1530_v56, 0.0  ;;  %v1564_v0 = vmax.f32 %v1532_v5, 0.0  ;;  %v1567_v44 = vmax.f32 %v1535_v34, 0.0 }
 0x5a2   :  { %v1569_v4 = vmax.f32 %v1537_v39, 0.0  ;;  %v1496_v48 = vmul.f32 %v3299_v60, %v3168_v63  ;;  %v1498_v9 = vmul.f32 %v3299_v60, %v3184_v53  ;;  %v1534_v40 = vadd.f32 %v3333_v30, %v1491_v43 }
 0x5a3   :  { %v1588_v33 = vpack.c.bf16 %v1564_v0, %v1562_v25  ;;  %v1536_v36 = vadd.f32 %v3333_v30, %v1493_v32  ;;  %v1495_v63 = vmul.f32 %v3296_v51, %v3162_v62  ;;  %v1497_v53 = vmul.f32 %v3296_v51, %v3180_v46  ;;  %v3413_v62 = vld [vmem:[%s3497_s18] ss:$0 sm:$0xff] }
 0x5a4   :  { %v1591_v31 = vpack.c.bf16 %v1569_v4, %v1567_v44  ;;  %v1539_v35 = vadd.f32 %v3336_v21, %v1496_v48  ;;  %v1541_v41 = vadd.f32 %v3336_v21, %v1498_v9  ;;  %v1566_v38 = vmax.f32 %v1534_v40, 0.0 }
 0x5a5   :  { %v1568_v45 = vmax.f32 %v1536_v36, 0.0  ;;  %v1538_v20 = vadd.f32 %v3333_v30, %v1495_v63  ;;  %v1540_v28 = vadd.f32 %v3333_v30, %v1497_v53 }
 0x5a6   :  { %v1571_v7 = vmax.f32 %v1539_v35, 0.0  ;;  %v1573_v47 = vmax.f32 %v1541_v41, 0.0 }
 0x5a7   :  { %1782 = vmatmul.mubr.bf16.gmra.mrb[40].mxu0 %v1586_v50  ;;  %v1590_v60 = vpack.c.bf16 %v1568_v45, %v1566_v38  ;;  %v1570_v21 = vmax.f32 %v1538_v20, 0.0  ;;  %v1572_v49 = vmax.f32 %v1540_v28, 0.0 }
 0x5a8   :  { %1789 = vmatprep.mubr.bf16.mxu0 %v1589_v11  ;;  %v1593_v24 = vpack.c.bf16 %v1573_v47, %v1571_v7 }
 0x5a9   :  { %v1592_v19 = vpack.c.bf16 %v1572_v49, %v1570_v21 }
 0x5af   :  { %1790 = vmatmul.mubr.bf16.gmra.mrb[44].mxu0 %v1588_v33 }
 0x5b0   :  { %1797 = vmatprep.mubr.bf16.mxu0 %v1591_v31 }
 0x5b7   :  { %1798 = vmatmul.mubr.bf16.gmra.mrb[48].mxu0 %v1590_v60 }
 0x5b8   :  { %1805 = vmatprep.mubr.bf16.mxu0 %v1593_v24 }
 0x5bf   :  { %1806 = vmatmul.mubr.bf16.gmra.mrb[52].mxu0 %v1592_v19 }
 0x66a   :  { %v2086_v16 = vpop.f32.mrb[32].mxu0  ;;  %v2122_v12 = vpop.f32.mrb[48].mxu1 }
 0x66b   :  { %v2087_v46 = vpop.f32.mrb[33].mxu0  ;;  %v2123_v51 = vpop.f32.mrb[49].mxu1 }
 0x66c   :  { %v2088_v61 = vadd.f32 %v2087_v46, %v2086_v16  ;;  %v2124_v55 = vadd.f32 %v2123_v51, %v2122_v12  ;;  %v2089_v23 = vpop.f32.mrb[34].mxu0  ;;  %v2125_v30 = vpop.f32.mrb[50].mxu1 }
 0x66d   :  { %v2090_v29 = vpop.f32.mrb[35].mxu0  ;;  %v2126_v17 = vpop.f32.mrb[51].mxu1 }
 0x66e   :  { %v1768_v2 = vadd.f32 %v2088_v61, %v3413_v62  ;;  %v1816_v18 = vadd.f32 %v2124_v55, %v3413_v62  ;;  %v2091_v3 = vadd.f32 %v2090_v29, %v2089_v23  ;;  %v2127_v37 = vadd.f32 %v2126_v17, %v2125_v30 }
 0x670   :  { %v2006_v15 = vmul.f32 -1.442695, %v1768_v2  ;;  %v2018_v52 = vmul.f32 -1.442695, %v1816_v18  ;;  %v1771_v57 = vadd.f32 %v2091_v3, %v3413_v62  ;;  %v1819_v42 = vadd.f32 %v2127_v37, %v3413_v62 }
 0x672   :  { %2322 = vpow2.f32 %v2006_v15  ;;  %v2007_v8 = vmul.f32 -1.442695, %v1771_v57  ;;  %v2019_v58 = vmul.f32 -1.442695, %v1819_v42  ;;  %v2092_v1 = vpop.f32.mrb[36].mxu0  ;;  %v2128_v10 = vpop.f32.mrb[52].mxu1 }
 0x673   :  { %2324 = vpow2.f32 %v2018_v52  ;;  %v2093_v59 = vpop.f32.mrb[37].mxu0  ;;  %v2129_v22 = vpop.f32.mrb[53].mxu1 }
 0x674   :  { %2326 = vpow2.f32 %v2007_v8  ;;  %v2094_v26 = vadd.f32 %v2093_v59, %v2092_v1  ;;  %v2130_v27 = vadd.f32 %v2129_v22, %v2128_v10  ;;  %v2095_v14 = vpop.f32.mrb[38].mxu0  ;;  %v2131_v13 = vpop.f32.mrb[54].mxu1 }
 0x675   :  { %2328 = vpow2.f32 %v2019_v58  ;;  %v2096_v54 = vpop.f32.mrb[39].mxu0  ;;  %v2132_v6 = vpop.f32.mrb[55].mxu1 }
 0x676   :  { %v1776_v50 = vadd.f32 %v2094_v26, %v3413_v62  ;;  %v1824_v56 = vadd.f32 %v2130_v27, %v3413_v62  ;;  %v2097_v5 = vadd.f32 %v2096_v54, %v2095_v14  ;;  %v2133_v11 = vadd.f32 %v2132_v6, %v2131_v13 }
 0x678   :  { %v2008_v34 = vmul.f32 -1.442695, %v1776_v50  ;;  %v2020_v39 = vmul.f32 -1.442695, %v1824_v56  ;;  %v1779_v25 = vadd.f32 %v2097_v5, %v3413_v62  ;;  %v1827_v0 = vadd.f32 %v2133_v11, %v3413_v62 }
 0x67a   :  { %2330 = vpow2.f32 %v2008_v34  ;;  %v2009_v44 = vmul.f32 -1.442695, %v1779_v25  ;;  %v2021_v4 = vmul.f32 -1.442695, %v1827_v0  ;;  %v2098_v43 = vpop.f32.mrb[40].mxu0 }
 0x67b   :  { %2332 = vpow2.f32 %v2020_v39  ;;  %v2099_v32 = vpop.f32.mrb[41].mxu0 }
 0x67c   :  { %v2323_v48 = vpop.eup %2322  ;;  %2334 = vpow2.f32 %v2009_v44  ;;  %v2100_v9 = vadd.f32 %v2099_v32, %v2098_v43  ;;  %v2101_v33 = vpop.f32.mrb[42].mxu0 }
 0x67d   :  { %v2325_v40 = vpop.eup %2324  ;;  %v1878_v36 = vadd.f32 1.0, %v2323_v48  ;;  %2336 = vpow2.f32 %v2021_v4  ;;  %v2102_v31 = vpop.f32.mrb[43].mxu0 }
 0x67e   :  { %v2327_v35 = vpop.eup %2326  ;;  %v1890_v41 = vadd.f32 1.0, %v2325_v40  ;;  %v1784_v38 = vadd.f32 %v2100_v9, %v3413_v62  ;;  %v2103_v45 = vadd.f32 %v2102_v31, %v2101_v33 }
 0x67f   :  { %v2329_v7 = vpop.eup %2328  ;;  %2338 = vrcp.f32 %v1878_v36  ;;  %v1879_v47 = vadd.f32 1.0, %v2327_v35 }
 0x680   :  { %2340 = vrcp.f32 %v1890_v41  ;;  %v1891_v63 = vadd.f32 1.0, %v2329_v7  ;;  %v2010_v53 = vmul.f32 -1.442695, %v1784_v38  ;;  %v1787_v60 = vadd.f32 %v2103_v45, %v3413_v62 }
 0x681   :  { %2342 = vrcp.f32 %v1879_v47 }
 0x682   :  { %2344 = vrcp.f32 %v1891_v63  ;;  %v2011_v20 = vmul.f32 -1.442695, %v1787_v60  ;;  %v2104_v28 = vpop.f32.mrb[44].mxu0 }
 0x683   :  { %2346 = vpow2.f32 %v2010_v53  ;;  %v2105_v24 = vpop.f32.mrb[45].mxu0 }
 0x684   :  { %v2331_v21 = vpop.eup %2330  ;;  %2348 = vpow2.f32 %v2011_v20  ;;  %v2106_v49 = vadd.f32 %v2105_v24, %v2104_v28  ;;  %v2107_v19 = vpop.f32.mrb[46].mxu0 }
 0x685   :  { %v2333_v16 = vpop.eup %2332  ;;  %v1880_v12 = vadd.f32 1.0, %v2331_v21  ;;  %v2108_v46 = vpop.f32.mrb[47].mxu0 }
 0x686   :  { %v2335_v51 = vpop.eup %2334  ;;  %v1892_v61 = vadd.f32 1.0, %v2333_v16  ;;  %v1792_v55 = vadd.f32 %v2106_v49, %v3413_v62  ;;  %v2109_v23 = vadd.f32 %v2108_v46, %v2107_v19 }
 0x687   :  { %v2337_v30 = vpop.eup %2336  ;;  %2350 = vrcp.f32 %v1880_v12  ;;  %v1881_v29 = vadd.f32 1.0, %v2335_v51 }
 0x688   :  { %2352 = vrcp.f32 %v1892_v61  ;;  %v1893_v17 = vadd.f32 1.0, %v2337_v30  ;;  %v2012_v2 = vmul.f32 -1.442695, %v1792_v55  ;;  %v1795_v18 = vadd.f32 %v2109_v23, %v3413_v62 }
 0x689   :  { %v2339_v3 = vpop.eup %2338  ;;  %2354 = vrcp.f32 %v1881_v29 }
 0x68a   :  { %v2341_v37 = vpop.eup %2340  ;;  %1926 = vst [vmem:[%s3498_s19] sm:$0xff] %v2339_v3  ;;  %2356 = vrcp.f32 %v1893_v17  ;;  %v2013_v15 = vmul.f32 -1.442695, %v1795_v18  ;;  %v2110_v52 = vpop.f32.mrb[48].mxu0 }
 0x68b   :  { %v2343_v57 = vpop.eup %2342  ;;  %1938 = vst [vmem:[%s3498_s19 + $0x60] sm:$0xff] %v2341_v37  ;;  %2358 = vpow2.f32 %v2012_v2  ;;  %v2111_v42 = vpop.f32.mrb[49].mxu0 }
 0x68c   :  { %v2345_v8 = vpop.eup %2344  ;;  %1927 = vst [vmem:[%s3498_s19 + $0x8] sm:$0xff] %v2343_v57  ;;  %2360 = vpow2.f32 %v2013_v15  ;;  %v2112_v58 = vadd.f32 %v2111_v42, %v2110_v52  ;;  %v2113_v1 = vpop.f32.mrb[50].mxu0 }
 0x68d   :  { %v2347_v10 = vpop.eup %2346  ;;  %1939 = vst [vmem:[%s3498_s19 + $0x68] sm:$0xff] %v2345_v8  ;;  %v2114_v59 = vpop.f32.mrb[51].mxu0 }
 0x68e   :  { %v2349_v22 = vpop.eup %2348  ;;  %v1882_v26 = vadd.f32 1.0, %v2347_v10  ;;  %v1800_v27 = vadd.f32 %v2112_v58, %v3413_v62  ;;  %v2115_v14 = vadd.f32 %v2114_v59, %v2113_v1 }
 0x68f   :  { %v1883_v13 = vadd.f32 1.0, %v2349_v22 }
 0x690   :  { %2362 = vrcp.f32 %v1882_v26  ;;  %v2014_v54 = vmul.f32 -1.442695, %v1800_v27  ;;  %v1803_v6 = vadd.f32 %v2115_v14, %v3413_v62 }
 0x691   :  { %v2351_v50 = vpop.eup %2350  ;;  %2364 = vrcp.f32 %v1883_v13 }
 0x692   :  { %v2353_v56 = vpop.eup %2352  ;;  %1928 = vst [vmem:[%s3498_s19 + $0x10] sm:$0xff] %v2351_v50  ;;  %2366 = vpow2.f32 %v2014_v54  ;;  %v2015_v5 = vmul.f32 -1.442695, %v1803_v6  ;;  %v2116_v11 = vpop.f32.mrb[52].mxu0 }
 0x693   :  { %v2355_v34 = vpop.eup %2354  ;;  %1940 = vst [vmem:[%s3498_s19 + $0x70] sm:$0xff] %v2353_v56  ;;  %v2117_v39 = vpop.f32.mrb[53].mxu0 }
 0x694   :  { %v2357_v25 = vpop.eup %2356  ;;  %1929 = vst [vmem:[%s3498_s19 + $0x18] sm:$0xff] %v2355_v34  ;;  %2368 = vpow2.f32 %v2015_v5  ;;  %v2118_v0 = vadd.f32 %v2117_v39, %v2116_v11  ;;  %v2119_v44 = vpop.f32.mrb[54].mxu0 }
 0x695   :  { %v2359_v4 = vpop.eup %2358  ;;  %1941 = vst [vmem:[%s3498_s19 + $0x78] sm:$0xff] %v2357_v25  ;;  %v2120_v43 = vpop.f32.mrb[55].mxu0 }
 0x696   :  { %v2361_v32 = vpop.eup %2360  ;;  %v1884_v48 = vadd.f32 1.0, %v2359_v4  ;;  %v1808_v9 = vadd.f32 %v2118_v0, %v3413_v62  ;;  %v2121_v33 = vadd.f32 %v2120_v43, %v2119_v44 }
 0x697   :  { %v1885_v40 = vadd.f32 1.0, %v2361_v32 }
 0x698   :  { %2370 = vrcp.f32 %v1884_v48  ;;  %v2016_v36 = vmul.f32 -1.442695, %v1808_v9  ;;  %v1811_v31 = vadd.f32 %v2121_v33, %v3413_v62 }
 0x699   :  { %2372 = vrcp.f32 %v1885_v40 }
 0x69a   :  { %v2363_v35 = vpop.eup %2362  ;;  %2374 = vpow2.f32 %v2016_v36  ;;  %v2017_v41 = vmul.f32 -1.442695, %v1811_v31 }
 0x69b   :  { %v2365_v38 = vpop.eup %2364  ;;  %1930 = vst [vmem:[%s3498_s19 + $0x20] sm:$0xff] %v2363_v35 }
 0x69c   :  { %v2367_v45 = vpop.eup %2366  ;;  %1931 = vst [vmem:[%s3498_s19 + $0x28] sm:$0xff] %v2365_v38  ;;  %2376 = vpow2.f32 %v2017_v41 }
 0x69d   :  { %v1886_v7 = vadd.f32 1.0, %v2367_v45 }
 0x69e   :  { %v2369_v47 = vpop.eup %2368 }
 0x69f   :  { %2378 = vrcp.f32 %v1886_v7  ;;  %v1887_v63 = vadd.f32 1.0, %v2369_v47 }
 0x6a1   :  { %2380 = vrcp.f32 %v1887_v63 }
 0x6a2   :  { %v2371_v62 = vpop.eup %2370 }
 0x6a3   :  { %v2373_v53 = vpop.eup %2372  ;;  %1932 = vst [vmem:[%s3498_s19 + $0x30] sm:$0xff] %v2371_v62 }
 0x6a4   :  { %v2375_v60 = vpop.eup %2374  ;;  %1933 = vst [vmem:[%s3498_s19 + $0x38] sm:$0xff] %v2373_v53 }
 0x6a5   :  { %v1888_v20 = vadd.f32 1.0, %v2375_v60 }
 0x6a6   :  { %v2377_v28 = vpop.eup %2376 }
 0x6a7   :  { %2382 = vrcp.f32 %v1888_v20  ;;  %v1889_v24 = vadd.f32 1.0, %v2377_v28 }
 0x6a9   :  { %v2379_v21 = vpop.eup %2378  ;;  %2384 = vrcp.f32 %v1889_v24 }
 0x6aa   :  { %1934 = vst [vmem:[%s3498_s19 + $0x40] sm:$0xff] %v2379_v21 }
 0x6ab   :  { %v2381_v49 = vpop.eup %2380 }
 0x6ac   :  { %1935 = vst [vmem:[%s3498_s19 + $0x48] sm:$0xff] %v2381_v49 }
 0x6b1   :  { %v2383_v19 = vpop.eup %2382 }
 0x6b2   :  { %1936 = vst [vmem:[%s3498_s19 + $0x50] sm:$0xff] %v2383_v19 }
 0x6b3   :  { %v2385_v16 = vpop.eup %2384 }
 0x6b4   :  { %1937 = vst [vmem:[%s3498_s19 + $0x58] sm:$0xff] %v2385_v16 }

</bundles_post_ra>
